<compile_context>
chip_gen: v7x
topology: tpu7x:2x2x1
jax: 0.10.0
libtpu: 0.0.40
codegen_flags: <defaults>
</compile_context>

<pallas_src>
import jax
import jax.numpy as jnp
from jax.experimental import pallas as pl
from jax.experimental.pallas import tpu as pltpu

LANE = 128
BF16_SUBLANE = 16


def _round_up(x, m):
    return (x + m - 1) // m * m


def mlp_kernel(x_ref,
               w1_ref, b1_ref,
               w2_ref, b2_ref,
               w3_ref, b3_ref,
               w4_ref, b4_ref,
               w5_ref, b5_ref,
               o_ref,
               acc_ref):
    """Fused 5-layer MLP.

    Grid: (batch_tiles [parallel], k_tiles [arbitrary]).
    Layer-1 partial products accumulate into the f32 scratch `acc_ref`;
    layers 2-5, the sigmoid and the single lane-dense output store run only
    on the last K step.  bf16 inputs/weights, f32 MXU accumulation.
    """
    k = pl.program_id(1)

    @pl.when(k == 0)
    def _():
        acc_ref[...] = jnp.zeros_like(acc_ref)

    acc_ref[...] += jnp.dot(x_ref[...], w1_ref[...],
                            preferred_element_type=jnp.float32)

    @pl.when(k == pl.num_programs(1) - 1)
    def _():
        h = jnp.maximum(acc_ref[...] + b1_ref[...], 0.0).astype(jnp.bfloat16)

        h = jnp.dot(h, w2_ref[...], preferred_element_type=jnp.float32) + b2_ref[...]
        h = jnp.maximum(h, 0.0).astype(jnp.bfloat16)

        h = jnp.dot(h, w3_ref[...], preferred_element_type=jnp.float32) + b3_ref[...]
        h = jnp.maximum(h, 0.0).astype(jnp.bfloat16)

        h = jnp.dot(h, w4_ref[...], preferred_element_type=jnp.float32) + b4_ref[...]
        h = jnp.maximum(h, 0.0).astype(jnp.bfloat16)

        logits = jnp.dot(h, w5_ref[...], preferred_element_type=jnp.float32) + b5_ref[...]
        o_ref[...] = jax.nn.sigmoid(logits).astype(o_ref.dtype)


def _pad2(a, rows, cols, dtype):
    a = a.astype(dtype)
    if a.shape == (rows, cols):
        return a
    return jnp.pad(a, ((0, rows - a.shape[0]), (0, cols - a.shape[1])))


def bloom_filter_two_gram_forward(x, params, *, batch_tile=None, k_tile_cap=2048):
    """x: [B, input_dim] float. params: [(W [in,out] f32, b [1,out] f32)] * 5."""
    B, input_dim = x.shape
    hidden_dim = params[0][0].shape[1]
    num_two_grams = params[-1][0].shape[1]

    hidden_pad = _round_up(hidden_dim, LANE)
    n_out_pad = _round_up(num_two_grams, LANE)          # 676 -> 768 lane-dense

    # ---- batch tiling ----------------------------------------------------
    B16 = _round_up(B, BF16_SUBLANE)
    if batch_tile is None:
        if B16 <= 256:
            batch_tile = B16                             # tiny batch: one small tile
        elif B16 <= 1024:
            # two tiles: fills the 256-wide MXU and gives both v7x TCs work
            batch_tile = _round_up((B16 + 1) // 2, BF16_SUBLANE)
        else:
            batch_tile = 512                             # 512-row tiles (2 x 256)
    batch_tile = max(BF16_SUBLANE, _round_up(min(batch_tile, B16), BF16_SUBLANE))
    B_pad = _round_up(B, batch_tile)

    # ---- K tiling for layer 1 ---------------------------------------------
    if input_dim <= k_tile_cap:
        k_tile = input_dim                               # single step, full-dim block
        K_pad = input_dim
        num_k = 1
    else:
        k_tile = _round_up(k_tile_cap, LANE)
        K_pad = _round_up(input_dim, k_tile)
        num_k = K_pad // k_tile

    # ---- pad / cast operands (single jnp.pad only when needed) ------------
    xb = x.astype(jnp.bfloat16)
    if B_pad != B or K_pad != input_dim:
        xb = jnp.pad(xb, ((0, B_pad - B), (0, K_pad - input_dim)))

    (W1, b1), (W2, b2), (W3, b3), (W4, b4), (W5, b5) = params
    flat = [
        _pad2(W1, K_pad, hidden_pad, jnp.bfloat16),
        _pad2(b1, 1, hidden_pad, jnp.float32),
        _pad2(W2, hidden_pad, hidden_pad, jnp.bfloat16),
        _pad2(b2, 1, hidden_pad, jnp.float32),
        _pad2(W3, hidden_pad, hidden_pad, jnp.bfloat16),
        _pad2(b3, 1, hidden_pad, jnp.float32),
        _pad2(W4, hidden_pad, hidden_pad, jnp.bfloat16),
        _pad2(b4, 1, hidden_pad, jnp.float32),
        _pad2(W5, hidden_pad, n_out_pad, jnp.bfloat16),
        _pad2(b5, 1, n_out_pad, jnp.float32),
    ]

    # ---- specs -------------------------------------------------------------
    x_spec = pl.BlockSpec((batch_tile, k_tile), lambda i, k: (i, k))
    o_spec = pl.BlockSpec((batch_tile, n_out_pad), lambda i, k: (i, 0))

    def make_in_specs(single_buffer):
        kw = dict(pipeline_mode=pl.Buffered(1)) if single_buffer else {}

        def resident(shape):
            return pl.BlockSpec(shape, lambda i, k: (0, 0), **kw)

        if num_k == 1:
            w1_spec = resident(flat[0].shape)            # W1 fully resident
        else:
            # W1 streamed in K chunks; default double-buffering overlaps DMA.
            w1_spec = pl.BlockSpec((k_tile, hidden_pad), lambda i, k: (k, 0))

        return [x_spec, w1_spec,
                resident(flat[1].shape),                 # b1
                resident(flat[2].shape), resident(flat[3].shape),   # W2, b2
                resident(flat[4].shape), resident(flat[5].shape),   # W3, b3
                resident(flat[6].shape), resident(flat[7].shape),   # W4, b4
                resident(flat[8].shape), resident(flat[9].shape)]   # W5, b5

    # ---- VMEM budget from actual footprint ---------------------------------
    resident_bytes = sum(int(a.size) * a.dtype.itemsize for a in flat[1:])
    w1_tile_bytes = k_tile * hidden_pad * 2
    x_tile_bytes = batch_tile * k_tile * 2
    out_tile_bytes = batch_tile * n_out_pad * 2
    acc_bytes = batch_tile * hidden_pad * 4
    act_bytes = 4 * batch_tile * max(hidden_pad, n_out_pad) * 4     # f32/bf16 temps
    footprint = (2 * resident_bytes                      # worst case: 2x buffered fallback
                 + 2 * (w1_tile_bytes + x_tile_bytes + out_tile_bytes)
                 + acc_bytes + act_bytes)
    try:
        vmem_cap = int(pltpu.get_tpu_info().vmem_capacity_bytes)
    except Exception:
        vmem_cap = 64 << 20                              # v7x physical VMEM (smallest)
    vmem_limit = int(min(max(footprint + (4 << 20), 16 << 20), vmem_cap - (8 << 20)))

    grid = (B_pad // batch_tile, num_k)

    def build(single_buffer):
        return pl.pallas_call(
            mlp_kernel,
            out_shape=jax.ShapeDtypeStruct((B_pad, n_out_pad), jnp.bfloat16),
            grid=grid,
            in_specs=make_in_specs(single_buffer),
            out_specs=o_spec,
            scratch_shapes=[pltpu.VMEM((batch_tile, hidden_pad), jnp.float32)],
            compiler_params=pltpu.CompilerParams(
                dimension_semantics=("parallel", "arbitrary"),
                vmem_limit_bytes=vmem_limit,
            ),
        )

    args = (xb, *flat)
    try:
        out = build(True)(*args)     # single-buffered resident weights (VMEM win)
    except Exception:
        # pipeline_mode=Buffered(1) unsupported on this jax/libtpu combo:
        # fall back to default double-buffering (correct, just more VMEM).
        out = build(False)(*args)

    # Drop batch padding and the lane padding (padded lanes hold sigmoid(0)=0.5).
    return out[:B, :num_two_grams]


def init_params(key, input_dim, hidden_dim, num_two_grams):
    """Deterministic init matching nn.Linear shapes (stored as [in, out], f32)."""
    dims = [(input_dim, hidden_dim),
            (hidden_dim, hidden_dim),
            (hidden_dim, hidden_dim),
            (hidden_dim, hidden_dim),
            (hidden_dim, num_two_grams)]
    params = []
    for (fan_in, fan_out) in dims:
        key, kw, kb = jax.random.split(key, 3)
        bound = 1.0 / jnp.sqrt(fan_in)
        W = jax.random.uniform(kw, (fan_in, fan_out), jnp.float32, -bound, bound)
        b = jax.random.uniform(kb, (1, fan_out), jnp.float32, -bound, bound)
        params.append((W, b))
    return params


def reference_forward(x, params):
    """Pure-JAX f32 reference (eval-mode: dropout = identity)."""
    h = x
    for i, (W, b) in enumerate(params):
        h = jnp.dot(h, W, precision=jax.lax.Precision.HIGHEST) + b
        if i < len(params) - 1:
            h = jnp.maximum(h, 0.0)
        else:
            h = jax.nn.sigmoid(h)
    return h


if __name__ == "__main__":
    batch = 4
    input_dim = 256       # bloom-filter bit-vector length (small test size)
    hidden_dim = 128      # small stand-in for the default 512
    num_two_grams = 676   # 26*26 two-grams, as in the module default

    key = jax.random.PRNGKey(0)
    key, kx = jax.random.split(key)
    # bloom-filter-like binary input
    x = (jax.random.uniform(kx, (batch, input_dim)) > 0.5).astype(jnp.float32)

    params = init_params(key, input_dim, hidden_dim, num_two_grams)
    ref = reference_forward(x, params)

    # 1) default path (single K step, fully resident weights)
    out = bloom_filter_two_gram_forward(x, params)
    out = jax.block_until_ready(out)
    assert out.shape == (batch, num_two_grams)
    assert jnp.allclose(out.astype(jnp.float32), ref, atol=3e-2, rtol=3e-2), (
        "mismatch vs reference (default path), max abs diff = %e"
        % float(jnp.max(jnp.abs(out.astype(jnp.float32) - ref))))

    # 2) force the K-tiled layer-1 path (k_tile_cap < input_dim -> 2 K steps)
    out_kt = bloom_filter_two_gram_forward(x, params, k_tile_cap=128)
    out_kt = jax.block_until_ready(out_kt)
    assert out_kt.shape == (batch, num_two_grams)
    assert jnp.allclose(out_kt.astype(jnp.float32), ref, atol=3e-2, rtol=3e-2), (
        "mismatch vs reference (K-tiled path), max abs diff = %e"
        % float(jnp.max(jnp.abs(out_kt.astype(jnp.float32) - ref))))

    print("KERNEL_OK")
</pallas_src>

<mosaic_0001>
module attributes {stable_mosaic.version = 11 : i64} {
  func.func @mlp_kernel(%arg0: i32, %arg1: i32, %arg2: memref<16x256xbf16, #tpu.memory_space<vmem>>, %arg3: memref<256x128xbf16, #tpu.memory_space<vmem>>, %arg4: memref<1x128xf32, #tpu.memory_space<vmem>>, %arg5: memref<128x128xbf16, #tpu.memory_space<vmem>>, %arg6: memref<1x128xf32, #tpu.memory_space<vmem>>, %arg7: memref<128x128xbf16, #tpu.memory_space<vmem>>, %arg8: memref<1x128xf32, #tpu.memory_space<vmem>>, %arg9: memref<128x128xbf16, #tpu.memory_space<vmem>>, %arg10: memref<1x128xf32, #tpu.memory_space<vmem>>, %arg11: memref<128x768xbf16, #tpu.memory_space<vmem>>, %arg12: memref<1x768xf32, #tpu.memory_space<vmem>>, %arg13: memref<16x768xbf16, #tpu.memory_space<vmem>>, %arg14: memref<16x128xf32, #tpu.memory_space<vmem>>) attributes {dimension_semantics = [#tpu.dimension_semantics<parallel>, #tpu.dimension_semantics<arbitrary>], iteration_bounds = array<i64: 1, 1>, scalar_prefetch = 0 : i64, scratch_operands = 1 : i64, tpu.core_type = #tpu.core_type<tc>, window_params = [{transform_indices = @transform_0, window_bounds = array<i64: 16, 256>}, {pipeline_mode = #tpu.pipeline_mode<synchronous>, transform_indices = @transform_1, window_bounds = array<i64: 256, 128>}, {pipeline_mode = #tpu.pipeline_mode<synchronous>, transform_indices = @transform_2, window_bounds = array<i64: 1, 128>}, {pipeline_mode = #tpu.pipeline_mode<synchronous>, transform_indices = @transform_3, window_bounds = array<i64: 128, 128>}, {pipeline_mode = #tpu.pipeline_mode<synchronous>, transform_indices = @transform_4, window_bounds = array<i64: 1, 128>}, {pipeline_mode = #tpu.pipeline_mode<synchronous>, transform_indices = @transform_5, window_bounds = array<i64: 128, 128>}, {pipeline_mode = #tpu.pipeline_mode<synchronous>, transform_indices = @transform_6, window_bounds = array<i64: 1, 128>}, {pipeline_mode = #tpu.pipeline_mode<synchronous>, transform_indices = @transform_7, window_bounds = array<i64: 128, 128>}, {pipeline_mode = #tpu.pipeline_mode<synchronous>, transform_indices = @transform_8, window_bounds = array<i64: 1, 128>}, {pipeline_mode = #tpu.pipeline_mode<synchronous>, transform_indices = @transform_9, window_bounds = array<i64: 128, 768>}, {pipeline_mode = #tpu.pipeline_mode<synchronous>, transform_indices = @transform_10, window_bounds = array<i64: 1, 768>}, {transform_indices = @transform_11, window_bounds = array<i64: 16, 768>}]} {
    %c0_i32 = arith.constant 0 : i32
    %0 = arith.cmpi eq, %arg1, %c0_i32 : i32
    %1 = arith.extui %0 : i1 to i32
    %c0_i32_0 = arith.constant 0 : i32
    %2 = arith.cmpi ne, %1, %c0_i32_0 : i32
    scf.if %2 {
      %cst_10 = arith.constant 0.000000e+00 : f32
      %12 = vector.broadcast %cst_10 : f32 to vector<16x128xf32>
      %c0_11 = arith.constant 0 : index
      %c0_12 = arith.constant 0 : index
      %13 = vector.load %arg14[%c0_11, %c0_12] : memref<16x128xf32, #tpu.memory_space<vmem>>, vector<16x128xf32>
      tpu.vector_store %arg14[%c0_11, %c0_12], %12 {strides = array<i32>} : memref<16x128xf32, #tpu.memory_space<vmem>>, vector<16x128xf32>,
    } else {
    }
    %c0 = arith.constant 0 : index
    %c0_1 = arith.constant 0 : index
    %3 = vector.load %arg14[%c0, %c0_1] : memref<16x128xf32, #tpu.memory_space<vmem>>, vector<16x128xf32>
    %c0_2 = arith.constant 0 : index
    %c0_3 = arith.constant 0 : index
    %4 = vector.load %arg2[%c0_2, %c0_3] : memref<16x256xbf16, #tpu.memory_space<vmem>>, vector<16x256xbf16>
    %c0_4 = arith.constant 0 : index
    %c0_5 = arith.constant 0 : index
    %5 = vector.load %arg3[%c0_4, %c0_5] : memref<256x128xbf16, #tpu.memory_space<vmem>>, vector<256x128xbf16>
    %cst = arith.constant dense<0.000000e+00> : vector<16x128xf32>
    %6 = tpu.matmul %4, %5, %cst {dimension_numbers = #tpu.dot_dimension_numbers<[1], [0], [0], [1], [0, 0, 1, 1], [], []>} : vector<16x256xbf16>, vector<256x128xbf16>, vector<16x128xf32> -> vector<16x128xf32>
    %7 = arith.addf %3, %6 : vector<16x128xf32>
    %c0_6 = arith.constant 0 : index
    %c0_7 = arith.constant 0 : index
    %8 = vector.load %arg14[%c0_6, %c0_7] : memref<16x128xf32, #tpu.memory_space<vmem>>, vector<16x128xf32>
    tpu.vector_store %arg14[%c0_6, %c0_7], %7 {strides = array<i32>} : memref<16x128xf32, #tpu.memory_space<vmem>>, vector<16x128xf32>,
    %c0_i32_8 = arith.constant 0 : i32
    %9 = arith.cmpi eq, %arg1, %c0_i32_8 : i32
    %10 = arith.extui %9 : i1 to i32
    %c0_i32_9 = arith.constant 0 : i32
    %11 = arith.cmpi ne, %10, %c0_i32_9 : i32
    scf.if %11 {
      %c0_10 = arith.constant 0 : index
      %c0_11 = arith.constant 0 : index
      %12 = vector.load %arg14[%c0_10, %c0_11] : memref<16x128xf32, #tpu.memory_space<vmem>>, vector<16x128xf32>
      %c0_12 = arith.constant 0 : index
      %c0_13 = arith.constant 0 : index
      %13 = vector.load %arg4[%c0_12, %c0_13] : memref<1x128xf32, #tpu.memory_space<vmem>>, vector<1x128xf32>
      %14 = vector.broadcast %13 : vector<1x128xf32> to vector<16x128xf32>
      %15 = arith.addf %12, %14 : vector<16x128xf32>
      %cst_14 = arith.constant 0.000000e+00 : f32
      %16 = vector.broadcast %cst_14 : f32 to vector<16x128xf32>
      %17 = arith.maximumf %15, %16 : vector<16x128xf32>
      %18 = arith.truncf %17 : vector<16x128xf32> to vector<16x128xbf16>
      %c0_15 = arith.constant 0 : index
      %c0_16 = arith.constant 0 : index
      %19 = vector.load %arg5[%c0_15, %c0_16] : memref<128x128xbf16, #tpu.memory_space<vmem>>, vector<128x128xbf16>
      %cst_17 = arith.constant dense<0.000000e+00> : vector<16x128xf32>
      %20 = tpu.matmul %18, %19, %cst_17 {dimension_numbers = #tpu.dot_dimension_numbers<[1], [0], [0], [1], [0, 0, 1, 1], [], []>} : vector<16x128xbf16>, vector<128x128xbf16>, vector<16x128xf32> -> vector<16x128xf32>
      %c0_18 = arith.constant 0 : index
      %c0_19 = arith.constant 0 : index
      %21 = vector.load %arg6[%c0_18, %c0_19] : memref<1x128xf32, #tpu.memory_space<vmem>>, vector<1x128xf32>
      %22 = vector.broadcast %21 : vector<1x128xf32> to vector<16x128xf32>
      %23 = arith.addf %20, %22 : vector<16x128xf32>
      %cst_20 = arith.constant 0.000000e+00 : f32
      %24 = vector.broadcast %cst_20 : f32 to vector<16x128xf32>
      %25 = arith.maximumf %23, %24 : vector<16x128xf32>
      %26 = arith.truncf %25 : vector<16x128xf32> to vector<16x128xbf16>
      %c0_21 = arith.constant 0 : index
      %c0_22 = arith.constant 0 : index
      %27 = vector.load %arg7[%c0_21, %c0_22] : memref<128x128xbf16, #tpu.memory_space<vmem>>, vector<128x128xbf16>
      %cst_23 = arith.constant dense<0.000000e+00> : vector<16x128xf32>
      %28 = tpu.matmul %26, %27, %cst_23 {dimension_numbers = #tpu.dot_dimension_numbers<[1], [0], [0], [1], [0, 0, 1, 1], [], []>} : vector<16x128xbf16>, vector<128x128xbf16>, vector<16x128xf32> -> vector<16x128xf32>
      %c0_24 = arith.constant 0 : index
      %c0_25 = arith.constant 0 : index
      %29 = vector.load %arg8[%c0_24, %c0_25] : memref<1x128xf32, #tpu.memory_space<vmem>>, vector<1x128xf32>
      %30 = vector.broadcast %29 : vector<1x128xf32> to vector<16x128xf32>
      %31 = arith.addf %28, %30 : vector<16x128xf32>
      %cst_26 = arith.constant 0.000000e+00 : f32
      %32 = vector.broadcast %cst_26 : f32 to vector<16x128xf32>
      %33 = arith.maximumf %31, %32 : vector<16x128xf32>
      %34 = arith.truncf %33 : vector<16x128xf32> to vector<16x128xbf16>
      %c0_27 = arith.constant 0 : index
      %c0_28 = arith.constant 0 : index
      %35 = vector.load %arg9[%c0_27, %c0_28] : memref<128x128xbf16, #tpu.memory_space<vmem>>, vector<128x128xbf16>
      %cst_29 = arith.constant dense<0.000000e+00> : vector<16x128xf32>
      %36 = tpu.matmul %34, %35, %cst_29 {dimension_numbers = #tpu.dot_dimension_numbers<[1], [0], [0], [1], [0, 0, 1, 1], [], []>} : vector<16x128xbf16>, vector<128x128xbf16>, vector<16x128xf32> -> vector<16x128xf32>
      %c0_30 = arith.constant 0 : index
      %c0_31 = arith.constant 0 : index
      %37 = vector.load %arg10[%c0_30, %c0_31] : memref<1x128xf32, #tpu.memory_space<vmem>>, vector<1x128xf32>
      %38 = vector.broadcast %37 : vector<1x128xf32> to vector<16x128xf32>
      %39 = arith.addf %36, %38 : vector<16x128xf32>
      %cst_32 = arith.constant 0.000000e+00 : f32
      %40 = vector.broadcast %cst_32 : f32 to vector<16x128xf32>
      %41 = arith.maximumf %39, %40 : vector<16x128xf32>
      %42 = arith.truncf %41 : vector<16x128xf32> to vector<16x128xbf16>
      %c0_33 = arith.constant 0 : index
      %c0_34 = arith.constant 0 : index
      %43 = vector.load %arg11[%c0_33, %c0_34] : memref<128x768xbf16, #tpu.memory_space<vmem>>, vector<128x768xbf16>
      %cst_35 = arith.constant dense<0.000000e+00> : vector<16x768xf32>
      %44 = tpu.matmul %42, %43, %cst_35 {dimension_numbers = #tpu.dot_dimension_numbers<[1], [0], [0], [1], [0, 0, 1, 1], [], []>} : vector<16x128xbf16>, vector<128x768xbf16>, vector<16x768xf32> -> vector<16x768xf32>
      %c0_36 = arith.constant 0 : index
      %c0_37 = arith.constant 0 : index
      %45 = vector.load %arg12[%c0_36, %c0_37] : memref<1x768xf32, #tpu.memory_space<vmem>>, vector<1x768xf32>
      %46 = vector.broadcast %45 : vector<1x768xf32> to vector<16x768xf32>
      %47 = arith.addf %44, %46 : vector<16x768xf32>
      %48 = arith.negf %47 : vector<16x768xf32>
      %49 = math.exp %48 : vector<16x768xf32>
      %cst_38 = arith.constant 1.000000e+00 : f32
      %50 = vector.broadcast %cst_38 : f32 to vector<16x768xf32>
      %51 = arith.addf %50, %49 : vector<16x768xf32>
      %52 = arith.divf %50, %51 : vector<16x768xf32>
      %53 = arith.truncf %52 : vector<16x768xf32> to vector<16x768xbf16>
      %c0_39 = arith.constant 0 : index
      %c0_40 = arith.constant 0 : index
      %54 = vector.load %arg13[%c0_39, %c0_40] : memref<16x768xbf16, #tpu.memory_space<vmem>>, vector<16x768xbf16>
      tpu.vector_store %arg13[%c0_39, %c0_40], %53 {strides = array<i32>} : memref<16x768xbf16, #tpu.memory_space<vmem>>, vector<16x768xbf16>,
    } else {
    }
    return
  }
  func.func @transform_0(%arg0: i32, %arg1: i32) -> (i32, i32) {
    %c0_i32 = arith.constant 0 : i32
    return %arg0, %arg1 : i32, i32
  }
  func.func @transform_1(%arg0: i32, %arg1: i32) -> (i32, i32) {
    %c0_i32 = arith.constant 0 : i32
    %c0_i32_0 = arith.constant 0 : i32
    %c0_i32_1 = arith.constant 0 : i32
    return %c0_i32, %c0_i32_0 : i32, i32
  }
  func.func @transform_2(%arg0: i32, %arg1: i32) -> (i32, i32) {
    %c0_i32 = arith.constant 0 : i32
    %c0_i32_0 = arith.constant 0 : i32
    %c0_i32_1 = arith.constant 0 : i32
    return %c0_i32, %c0_i32_0 : i32, i32
  }
  func.func @transform_3(%arg0: i32, %arg1: i32) -> (i32, i32) {
    %c0_i32 = arith.constant 0 : i32
    %c0_i32_0 = arith.constant 0 : i32
    %c0_i32_1 = arith.constant 0 : i32
    return %c0_i32, %c0_i32_0 : i32, i32
  }
  func.func @transform_4(%arg0: i32, %arg1: i32) -> (i32, i32) {
    %c0_i32 = arith.constant 0 : i32
    %c0_i32_0 = arith.constant 0 : i32
    %c0_i32_1 = arith.constant 0 : i32
    return %c0_i32, %c0_i32_0 : i32, i32
  }
  func.func @transform_5(%arg0: i32, %arg1: i32) -> (i32, i32) {
    %c0_i32 = arith.constant 0 : i32
    %c0_i32_0 = arith.constant 0 : i32
    %c0_i32_1 = arith.constant 0 : i32
    return %c0_i32, %c0_i32_0 : i32, i32
  }
  func.func @transform_6(%arg0: i32, %arg1: i32) -> (i32, i32) {
    %c0_i32 = arith.constant 0 : i32
    %c0_i32_0 = arith.constant 0 : i32
    %c0_i32_1 = arith.constant 0 : i32
    return %c0_i32, %c0_i32_0 : i32, i32
  }
  func.func @transform_7(%arg0: i32, %arg1: i32) -> (i32, i32) {
    %c0_i32 = arith.constant 0 : i32
    %c0_i32_0 = arith.constant 0 : i32
    %c0_i32_1 = arith.constant 0 : i32
    return %c0_i32, %c0_i32_0 : i32, i32
  }
  func.func @transform_8(%arg0: i32, %arg1: i32) -> (i32, i32) {
    %c0_i32 = arith.constant 0 : i32
    %c0_i32_0 = arith.constant 0 : i32
    %c0_i32_1 = arith.constant 0 : i32
    return %c0_i32, %c0_i32_0 : i32, i32
  }
  func.func @transform_9(%arg0: i32, %arg1: i32) -> (i32, i32) {
    %c0_i32 = arith.constant 0 : i32
    %c0_i32_0 = arith.constant 0 : i32
    %c0_i32_1 = arith.constant 0 : i32
    return %c0_i32, %c0_i32_0 : i32, i32
  }
  func.func @transform_10(%arg0: i32, %arg1: i32) -> (i32, i32) {
    %c0_i32 = arith.constant 0 : i32
    %c0_i32_0 = arith.constant 0 : i32
    %c0_i32_1 = arith.constant 0 : i32
    return %c0_i32, %c0_i32_0 : i32, i32
  }
  func.func @transform_11(%arg0: i32, %arg1: i32) -> (i32, i32) {
    %c0_i32 = arith.constant 0 : i32
    %c0_i32_0 = arith.constant 0 : i32
    return %arg0, %c0_i32 : i32, i32
  }
}

module attributes {stable_mosaic.version = 11 : i64} {
  func.func @mlp_kernel(%arg0: i32, %arg1: i32, %arg2: memref<16x256xbf16, #tpu.memory_space<vmem>>, %arg3: memref<256x128xbf16, #tpu.memory_space<vmem>>, %arg4: memref<1x128xf32, #tpu.memory_space<vmem>>, %arg5: memref<128x128xbf16, #tpu.memory_space<vmem>>, %arg6: memref<1x128xf32, #tpu.memory_space<vmem>>, %arg7: memref<128x128xbf16, #tpu.memory_space<vmem>>, %arg8: memref<1x128xf32, #tpu.memory_space<vmem>>, %arg9: memref<128x128xbf16, #tpu.memory_space<vmem>>, %arg10: memref<1x128xf32, #tpu.memory_space<vmem>>, %arg11: memref<128x768xbf16, #tpu.memory_space<vmem>>, %arg12: memref<1x768xf32, #tpu.memory_space<vmem>>, %arg13: memref<16x768xbf16, #tpu.memory_space<vmem>>, %arg14: memref<16x128xf32, #tpu.memory_space<vmem>>) attributes {dimension_semantics = [#tpu.dimension_semantics<parallel>, #tpu.dimension_semantics<arbitrary>], iteration_bounds = array<i64: 1, 1>, scalar_prefetch = 0 : i64, scratch_operands = 1 : i64, tpu.core_type = #tpu.core_type<tc>, window_params = [{transform_indices = @transform_0, window_bounds = array<i64: 16, 256>}, {pipeline_mode = #tpu.pipeline_mode<synchronous>, transform_indices = @transform_1, window_bounds = array<i64: 256, 128>}, {pipeline_mode = #tpu.pipeline_mode<synchronous>, transform_indices = @transform_2, window_bounds = array<i64: 1, 128>}, {pipeline_mode = #tpu.pipeline_mode<synchronous>, transform_indices = @transform_3, window_bounds = array<i64: 128, 128>}, {pipeline_mode = #tpu.pipeline_mode<synchronous>, transform_indices = @transform_4, window_bounds = array<i64: 1, 128>}, {pipeline_mode = #tpu.pipeline_mode<synchronous>, transform_indices = @transform_5, window_bounds = array<i64: 128, 128>}, {pipeline_mode = #tpu.pipeline_mode<synchronous>, transform_indices = @transform_6, window_bounds = array<i64: 1, 128>}, {pipeline_mode = #tpu.pipeline_mode<synchronous>, transform_indices = @transform_7, window_bounds = array<i64: 128, 128>}, {pipeline_mode = #tpu.pipeline_mode<synchronous>, transform_indices = @transform_8, window_bounds = array<i64: 1, 128>}, {pipeline_mode = #tpu.pipeline_mode<synchronous>, transform_indices = @transform_9, window_bounds = array<i64: 128, 768>}, {pipeline_mode = #tpu.pipeline_mode<synchronous>, transform_indices = @transform_10, window_bounds = array<i64: 1, 768>}, {transform_indices = @transform_11, window_bounds = array<i64: 16, 768>}]} {
    %c0_i32 = arith.constant 0 : i32
    %0 = arith.cmpi eq, %arg1, %c0_i32 : i32
    %1 = arith.extui %0 : i1 to i32
    %c0_i32_0 = arith.constant 0 : i32
    %2 = arith.cmpi ne, %1, %c0_i32_0 : i32
    scf.if %2 {
      %cst_10 = arith.constant 0.000000e+00 : f32
      %12 = vector.broadcast %cst_10 : f32 to vector<16x128xf32>
      %c0_11 = arith.constant 0 : index
      %c0_12 = arith.constant 0 : index
      %13 = vector.load %arg14[%c0_11, %c0_12] : memref<16x128xf32, #tpu.memory_space<vmem>>, vector<16x128xf32>
      tpu.vector_store %arg14[%c0_11, %c0_12], %12 {strides = array<i32>} : memref<16x128xf32, #tpu.memory_space<vmem>>, vector<16x128xf32>,
    } else {
    }
    %c0 = arith.constant 0 : index
    %c0_1 = arith.constant 0 : index
    %3 = vector.load %arg14[%c0, %c0_1] : memref<16x128xf32, #tpu.memory_space<vmem>>, vector<16x128xf32>
    %c0_2 = arith.constant 0 : index
    %c0_3 = arith.constant 0 : index
    %4 = vector.load %arg2[%c0_2, %c0_3] : memref<16x256xbf16, #tpu.memory_space<vmem>>, vector<16x256xbf16>
    %c0_4 = arith.constant 0 : index
    %c0_5 = arith.constant 0 : index
    %5 = vector.load %arg3[%c0_4, %c0_5] : memref<256x128xbf16, #tpu.memory_space<vmem>>, vector<256x128xbf16>
    %cst = arith.constant dense<0.000000e+00> : vector<16x128xf32>
    %6 = tpu.matmul %4, %5, %cst {dimension_numbers = #tpu.dot_dimension_numbers<[1], [0], [0], [1], [0, 0, 1, 1], [], []>} : vector<16x256xbf16>, vector<256x128xbf16>, vector<16x128xf32> -> vector<16x128xf32>
    %7 = arith.addf %3, %6 : vector<16x128xf32>
    %c0_6 = arith.constant 0 : index
    %c0_7 = arith.constant 0 : index
    %8 = vector.load %arg14[%c0_6, %c0_7] : memref<16x128xf32, #tpu.memory_space<vmem>>, vector<16x128xf32>
    tpu.vector_store %arg14[%c0_6, %c0_7], %7 {strides = array<i32>} : memref<16x128xf32, #tpu.memory_space<vmem>>, vector<16x128xf32>,
    %c0_i32_8 = arith.constant 0 : i32
    %9 = arith.cmpi eq, %arg1, %c0_i32_8 : i32
    %10 = arith.extui %9 : i1 to i32
    %c0_i32_9 = arith.constant 0 : i32
    %11 = arith.cmpi ne, %10, %c0_i32_9 : i32
    scf.if %11 {
      %c0_10 = arith.constant 0 : index
      %c0_11 = arith.constant 0 : index
      %12 = vector.load %arg14[%c0_10, %c0_11] : memref<16x128xf32, #tpu.memory_space<vmem>>, vector<16x128xf32>
      %c0_12 = arith.constant 0 : index
      %c0_13 = arith.constant 0 : index
      %13 = vector.load %arg4[%c0_12, %c0_13] : memref<1x128xf32, #tpu.memory_space<vmem>>, vector<1x128xf32>
      %14 = vector.broadcast %13 : vector<1x128xf32> to vector<16x128xf32>
      %15 = arith.addf %12, %14 : vector<16x128xf32>
      %cst_14 = arith.constant 0.000000e+00 : f32
      %16 = vector.broadcast %cst_14 : f32 to vector<16x128xf32>
      %17 = arith.maximumf %15, %16 : vector<16x128xf32>
      %18 = arith.truncf %17 : vector<16x128xf32> to vector<16x128xbf16>
      %c0_15 = arith.constant 0 : index
      %c0_16 = arith.constant 0 : index
      %19 = vector.load %arg5[%c0_15, %c0_16] : memref<128x128xbf16, #tpu.memory_space<vmem>>, vector<128x128xbf16>
      %cst_17 = arith.constant dense<0.000000e+00> : vector<16x128xf32>
      %20 = tpu.matmul %18, %19, %cst_17 {dimension_numbers = #tpu.dot_dimension_numbers<[1], [0], [0], [1], [0, 0, 1, 1], [], []>} : vector<16x128xbf16>, vector<128x128xbf16>, vector<16x128xf32> -> vector<16x128xf32>
      %c0_18 = arith.constant 0 : index
      %c0_19 = arith.constant 0 : index
      %21 = vector.load %arg6[%c0_18, %c0_19] : memref<1x128xf32, #tpu.memory_space<vmem>>, vector<1x128xf32>
      %22 = vector.broadcast %21 : vector<1x128xf32> to vector<16x128xf32>
      %23 = arith.addf %20, %22 : vector<16x128xf32>
      %cst_20 = arith.constant 0.000000e+00 : f32
      %24 = vector.broadcast %cst_20 : f32 to vector<16x128xf32>
      %25 = arith.maximumf %23, %24 : vector<16x128xf32>
      %26 = arith.truncf %25 : vector<16x128xf32> to vector<16x128xbf16>
      %c0_21 = arith.constant 0 : index
      %c0_22 = arith.constant 0 : index
      %27 = vector.load %arg7[%c0_21, %c0_22] : memref<128x128xbf16, #tpu.memory_space<vmem>>, vector<128x128xbf16>
      %cst_23 = arith.constant dense<0.000000e+00> : vector<16x128xf32>
      %28 = tpu.matmul %26, %27, %cst_23 {dimension_numbers = #tpu.dot_dimension_numbers<[1], [0], [0], [1], [0, 0, 1, 1], [], []>} : vector<16x128xbf16>, vector<128x128xbf16>, vector<16x128xf32> -> vector<16x128xf32>
      %c0_24 = arith.constant 0 : index
      %c0_25 = arith.constant 0 : index
      %29 = vector.load %arg8[%c0_24, %c0_25] : memref<1x128xf32, #tpu.memory_space<vmem>>, vector<1x128xf32>
      %30 = vector.broadcast %29 : vector<1x128xf32> to vector<16x128xf32>
      %31 = arith.addf %28, %30 : vector<16x128xf32>
      %cst_26 = arith.constant 0.000000e+00 : f32
      %32 = vector.broadcast %cst_26 : f32 to vector<16x128xf32>
      %33 = arith.maximumf %31, %32 : vector<16x128xf32>
      %34 = arith.truncf %33 : vector<16x128xf32> to vector<16x128xbf16>
      %c0_27 = arith.constant 0 : index
      %c0_28 = arith.constant 0 : index
      %35 = vector.load %arg9[%c0_27, %c0_28] : memref<128x128xbf16, #tpu.memory_space<vmem>>, vector<128x128xbf16>
      %cst_29 = arith.constant dense<0.000000e+00> : vector<16x128xf32>
      %36 = tpu.matmul %34, %35, %cst_29 {dimension_numbers = #tpu.dot_dimension_numbers<[1], [0], [0], [1], [0, 0, 1, 1], [], []>} : vector<16x128xbf16>, vector<128x128xbf16>, vector<16x128xf32> -> vector<16x128xf32>
      %c0_30 = arith.constant 0 : index
      %c0_31 = arith.constant 0 : index
      %37 = vector.load %arg10[%c0_30, %c0_31] : memref<1x128xf32, #tpu.memory_space<vmem>>, vector<1x128xf32>
      %38 = vector.broadcast %37 : vector<1x128xf32> to vector<16x128xf32>
      %39 = arith.addf %36, %38 : vector<16x128xf32>
      %cst_32 = arith.constant 0.000000e+00 : f32
      %40 = vector.broadcast %cst_32 : f32 to vector<16x128xf32>
      %41 = arith.maximumf %39, %40 : vector<16x128xf32>
      %42 = arith.truncf %41 : vector<16x128xf32> to vector<16x128xbf16>
      %c0_33 = arith.constant 0 : index
      %c0_34 = arith.constant 0 : index
      %43 = vector.load %arg11[%c0_33, %c0_34] : memref<128x768xbf16, #tpu.memory_space<vmem>>, vector<128x768xbf16>
      %cst_35 = arith.constant dense<0.000000e+00> : vector<16x768xf32>
      %44 = tpu.matmul %42, %43, %cst_35 {dimension_numbers = #tpu.dot_dimension_numbers<[1], [0], [0], [1], [0, 0, 1, 1], [], []>} : vector<16x128xbf16>, vector<128x768xbf16>, vector<16x768xf32> -> vector<16x768xf32>
      %c0_36 = arith.constant 0 : index
      %c0_37 = arith.constant 0 : index
      %45 = vector.load %arg12[%c0_36, %c0_37] : memref<1x768xf32, #tpu.memory_space<vmem>>, vector<1x768xf32>
      %46 = vector.broadcast %45 : vector<1x768xf32> to vector<16x768xf32>
      %47 = arith.addf %44, %46 : vector<16x768xf32>
      %48 = arith.negf %47 : vector<16x768xf32>
      %49 = math.exp %48 : vector<16x768xf32>
      %cst_38 = arith.constant 1.000000e+00 : f32
      %50 = vector.broadcast %cst_38 : f32 to vector<16x768xf32>
      %51 = arith.addf %50, %49 : vector<16x768xf32>
      %52 = arith.divf %50, %51 : vector<16x768xf32>
      %53 = arith.truncf %52 : vector<16x768xf32> to vector<16x768xbf16>
      %c0_39 = arith.constant 0 : index
      %c0_40 = arith.constant 0 : index
      %54 = vector.load %arg13[%c0_39, %c0_40] : memref<16x768xbf16, #tpu.memory_space<vmem>>, vector<16x768xbf16>
      tpu.vector_store %arg13[%c0_39, %c0_40], %53 {strides = array<i32>} : memref<16x768xbf16, #tpu.memory_space<vmem>>, vector<16x768xbf16>,
    } else {
    }
    return
  }
  func.func @transform_0(%arg0: i32, %arg1: i32) -> (i32, i32) {
    %c0_i32 = arith.constant 0 : i32
    return %arg0, %arg1 : i32, i32
  }
  func.func @transform_1(%arg0: i32, %arg1: i32) -> (i32, i32) {
    %c0_i32 = arith.constant 0 : i32
    %c0_i32_0 = arith.constant 0 : i32
    %c0_i32_1 = arith.constant 0 : i32
    return %c0_i32, %c0_i32_0 : i32, i32
  }
  func.func @transform_2(%arg0: i32, %arg1: i32) -> (i32, i32) {
    %c0_i32 = arith.constant 0 : i32
    %c0_i32_0 = arith.constant 0 : i32
    %c0_i32_1 = arith.constant 0 : i32
    return %c0_i32, %c0_i32_0 : i32, i32
  }
  func.func @transform_3(%arg0: i32, %arg1: i32) -> (i32, i32) {
    %c0_i32 = arith.constant 0 : i32
    %c0_i32_0 = arith.constant 0 : i32
    %c0_i32_1 = arith.constant 0 : i32
    return %c0_i32, %c0_i32_0 : i32, i32
  }
  func.func @transform_4(%arg0: i32, %arg1: i32) -> (i32, i32) {
    %c0_i32 = arith.constant 0 : i32
    %c0_i32_0 = arith.constant 0 : i32
    %c0_i32_1 = arith.constant 0 : i32
    return %c0_i32, %c0_i32_0 : i32, i32
  }
  func.func @transform_5(%arg0: i32, %arg1: i32) -> (i32, i32) {
    %c0_i32 = arith.constant 0 : i32
    %c0_i32_0 = arith.constant 0 : i32
    %c0_i32_1 = arith.constant 0 : i32
    return %c0_i32, %c0_i32_0 : i32, i32
  }
  func.func @transform_6(%arg0: i32, %arg1: i32) -> (i32, i32) {
    %c0_i32 = arith.constant 0 : i32
    %c0_i32_0 = arith.constant 0 : i32
    %c0_i32_1 = arith.constant 0 : i32
    return %c0_i32, %c0_i32_0 : i32, i32
  }
  func.func @transform_7(%arg0: i32, %arg1: i32) -> (i32, i32) {
    %c0_i32 = arith.constant 0 : i32
    %c0_i32_0 = arith.constant 0 : i32
    %c0_i32_1 = arith.constant 0 : i32
    return %c0_i32, %c0_i32_0 : i32, i32
  }
  func.func @transform_8(%arg0: i32, %arg1: i32) -> (i32, i32) {
    %c0_i32 = arith.constant 0 : i32
    %c0_i32_0 = arith.constant 0 : i32
    %c0_i32_1 = arith.constant 0 : i32
    return %c0_i32, %c0_i32_0 : i32, i32
  }
  func.func @transform_9(%arg0: i32, %arg1: i32) -> (i32, i32) {
    %c0_i32 = arith.constant 0 : i32
    %c0_i32_0 = arith.constant 0 : i32
    %c0_i32_1 = arith.constant 0 : i32
    return %c0_i32, %c0_i32_0 : i32, i32
  }
  func.func @transform_10(%arg0: i32, %arg1: i32) -> (i32, i32) {
    %c0_i32 = arith.constant 0 : i32
    %c0_i32_0 = arith.constant 0 : i32
    %c0_i32_1 = arith.constant 0 : i32
    return %c0_i32, %c0_i32_0 : i32, i32
  }
  func.func @transform_11(%arg0: i32, %arg1: i32) -> (i32, i32) {
    %c0_i32 = arith.constant 0 : i32
    %c0_i32_0 = arith.constant 0 : i32
    return %arg0, %c0_i32 : i32, i32
  }
}

</mosaic_0001>

<bundles_post_ra>
// kernel: tpu_custom_call.1
= control target key start
LH: loop header
LB: loop body
LE: loop exit
PB: predicated region body
PF: predicated region fallthrough
CT: control target
= control target key end

     0   :  { %16 = vsyncpa [#allocation4], 0  ;;  %s2069_s0 = inlined_call_operand.hbm [shape: bf16[16,256], index: 0, kind: input, shape index: {}]   ;;  %s2070_s1 = inlined_call_operand.hbm [shape: bf16[256,128], index: 1, kind: input, shape index: {}]   ;;  %s2071_s2 = inlined_call_operand.vmem [shape: f32[1,128], index: 2, kind: input, shape index: {}]   ;;  %s2072_s3 = inlined_call_operand.hbm [shape: bf16[128,128], index: 3, kind: input, shape index: {}]   ;;  %s2073_s4 = inlined_call_operand.vmem [shape: f32[1,128], index: 4, kind: input, shape index: {}]   ;;  %s2074_s5 = inlined_call_operand.hbm [shape: bf16[128,128], index: 5, kind: input, shape index: {}]   ;;  %s2075_s6 = inlined_call_operand.vmem [shape: f32[1,128], index: 6, kind: input, shape index: {}]   ;;  %s2076_s7 = inlined_call_operand.hbm [shape: bf16[128,128], index: 7, kind: input, shape index: {}]   ;;  %s2077_s8 = inlined_call_operand.vmem [shape: f32[1,128], index: 8, kind: input, shape index: {}]   ;;  %s2078_s9 = inlined_call_operand.hbm [shape: bf16[128,768], index: 9, kind: input, shape index: {}]   ;;  %s2079_s10 = inlined_call_operand.vmem [shape: f32[1,768], index: 10, kind: input, shape index: {}]   ;;  %s2080_s11 = inlined_call_operand.hbm [shape: bf16[16,768], index: 11, kind: output, shape index: {}]  }
   0x1   :  { %17 = vsyncpa [#allocation7], 0 }
   0x2   :  { %18 = vsyncpa [#allocation10], 0 }
   0x3   :  { %19 = vsyncpa [#allocation13], 0 }
   0x4   :  { %20 = vsyncpa [#allocation5], 0  ;;  %s1830_s17 = smov [#allocation6]   ;;  %s1666_s21 = scalar_lea.hbm %s2070_s1, 2048 }
   0x5   :  { %s38_s18 = sshll.u32 %s1830_s17, 4  ;;  %p1667_p0 = scmp.ne.s32.totalorder %s2070_s1, %s1666_s21  ;;  %s39_s18 = int_to_ptr.vmem [resolvable:$true] %s38_s18 }
   0x6   :  { %p1670_p1 = scmp.lt.u32.totalorder %s1666_s21, %s2070_s1 }
   0x8   :  { %p1672_p2 = pnand %p1670_p1, %p1667_p0 }
   0xa   :  { %1675 = shalt.err (!%p1672_p2)
}
   0xb   :  { %s1676_s26 = scalar_lea.vmem %s39_s18, 2048  ;;  %p1681_p4 = scmp.lt.s32.totalorder %s39_s18, %s39_s18 }
   0xc   :  { %p1677_p3 = scmp.ne.s32.totalorder %s39_s18, %s1676_s26  ;;  %p1682_p5 = scmp.lt.s32.totalorder %s1676_s26, %s1676_s26 }
   0xe   :  { %p1683_p6 = por %p1682_p5, %p1681_p4 }
  0x10   :  { %p1684_p7 = pnand %p1683_p6, %p1677_p3 }
  0x12   :  { %1687 = shalt.err (!%p1684_p7)
}
  0x13   :  { %s1831_s27 = smov 64   ;;  %s1832_s28 = smov 4  }
  0x14   :  { %44 = dma.hbm_to_vmem [thread:$0]  %s2070_s1, 2048, %s39_s18, [#allocation7], %s1831_s27, %s1831_s27, %s1832_s28  }
  0x15   :  { %s1833_s12 = smov [#allocation9]   ;;  %s1834_s14 = smov [#allocation3]  }
  0x16   :  { %s66_s13 = sshll.u32 %s1833_s12, 4  ;;  %s26_s15 = sshll.u32 %s1834_s14, 4  ;;  %s67_s13 = int_to_ptr.vmem [resolvable:$true] %s66_s13  ;;  %s27_s15 = int_to_ptr.vmem [resolvable:$true] %s26_s15 }
  0x17   :  { %s1688_s19 = scalar_lea.hbm %s2074_s5, 1024 }
  0x18   :  { %p1689_p8 = scmp.ne.s32.totalorder %s2074_s5, %s1688_s19  ;;  %p1692_p9 = scmp.lt.u32.totalorder %s1688_s19, %s2074_s5 }
  0x1a   :  { %p1694_p10 = pnand %p1692_p9, %p1689_p8 }
  0x1c   :  { %1697 = shalt.err (!%p1694_p10)
}
  0x1d   :  { %s1698_s1 = scalar_lea.vmem %s67_s13, 1024  ;;  %p1703_p12 = scmp.lt.s32.totalorder %s67_s13, %s67_s13 }
  0x1e   :  { %p1699_p11 = scmp.ne.s32.totalorder %s67_s13, %s1698_s1  ;;  %p1704_p13 = scmp.lt.s32.totalorder %s1698_s1, %s1698_s1 }
  0x20   :  { %p1705_p0 = por %p1704_p13, %p1703_p12 }
  0x22   :  { %p1706_p1 = pnand %p1705_p0, %p1699_p11 }
  0x24   :  { %1709 = shalt.err (!%p1706_p1)
}
  0x25   :  { %72 = dma.hbm_to_vmem [thread:$0]  %s2074_s5, 1024, %s67_s13, [#allocation10], %s1831_s27, %s1831_s27, %s1832_s28  }
  0x26   :  { %s1710_s29 = scalar_lea.hbm %s2069_s0, 256 }
  0x27   :  { %p1711_p2 = scmp.ne.s32.totalorder %s2069_s0, %s1710_s29  ;;  %p1714_p3 = scmp.lt.u32.totalorder %s1710_s29, %s2069_s0 }
  0x29   :  { %p1716_p4 = pnand %p1714_p3, %p1711_p2 }
  0x2b   :  { %1719 = shalt.err (!%p1716_p4)
}
  0x2c   :  { %s1720_s17 = scalar_lea.vmem %s27_s15, 256  ;;  %p1725_p6 = scmp.lt.s32.totalorder %s27_s15, %s27_s15 }
  0x2d   :  { %p1721_p5 = scmp.ne.s32.totalorder %s27_s15, %s1720_s17  ;;  %p1726_p7 = scmp.lt.s32.totalorder %s1720_s17, %s1720_s17 }
  0x2f   :  { %p1727_p8 = por %p1726_p7, %p1725_p6 }
  0x31   :  { %p1728_p9 = pnand %p1727_p8, %p1721_p5 }
  0x33   :  { %1731 = shalt.err (!%p1728_p9)
}
  0x34   :  { %s1835_s5 = smov 128   ;;  %s1836_s13 = smov 8  }
  0x35   :  { %32 = dma.hbm_to_vmem [thread:$0]  %s2069_s0, 256, %s27_s15, [#allocation4], %s1835_s5, %s1835_s5, %s1836_s13  }
  0x36   :  { %s1837_s21 = smov [#allocation8]   ;;  %s1838_s23 = smov [#allocation11]  }
  0x37   :  { %s52_s22 = sshll.u32 %s1837_s21, 4  ;;  %s80_s1 = sshll.u32 %s1838_s23, 4  ;;  %s53_s22 = int_to_ptr.vmem [resolvable:$true] %s52_s22  ;;  %s81_s1 = int_to_ptr.vmem [resolvable:$true] %s80_s1 }
  0x38   :  { %s1732_s25 = scalar_lea.hbm %s2072_s3, 1024 }
  0x39   :  { %p1733_p10 = scmp.ne.s32.totalorder %s2072_s3, %s1732_s25  ;;  %p1736_p11 = scmp.lt.u32.totalorder %s1732_s25, %s2072_s3 }
  0x3b   :  { %p1738_p12 = pnand %p1736_p11, %p1733_p10 }
  0x3d   :  { %1741 = shalt.err (!%p1738_p12)
}
  0x3e   :  { %s1742_s0 = scalar_lea.vmem %s53_s22, 1024  ;;  %p1747_p0 = scmp.lt.s32.totalorder %s53_s22, %s53_s22 }
  0x3f   :  { %p1743_p13 = scmp.ne.s32.totalorder %s53_s22, %s1742_s0  ;;  %p1748_p1 = scmp.lt.s32.totalorder %s1742_s0, %s1742_s0 }
  0x41   :  { %p1749_p2 = por %p1748_p1, %p1747_p0 }
  0x43   :  { %p1750_p3 = pnand %p1749_p2, %p1743_p13 }
  0x45   :  { %1753 = shalt.err (!%p1750_p3)
}
  0x46   :  { %58 = dma.hbm_to_vmem [thread:$0]  %s2072_s3, 1024, %s53_s22, [#allocation7], %s1831_s27, %s1831_s27, %s1832_s28  }
  0x47   :  { %s1754_s5 = scalar_lea.hbm %s2076_s7, 1024 }
  0x48   :  { %p1755_p4 = scmp.ne.s32.totalorder %s2076_s7, %s1754_s5  ;;  %p1758_p5 = scmp.lt.u32.totalorder %s1754_s5, %s2076_s7 }
  0x4a   :  { %p1760_p6 = pnand %p1758_p5, %p1755_p4 }
  0x4c   :  { %1763 = shalt.err (!%p1760_p6)
}
  0x4d   :  { %s1764_s23 = scalar_lea.vmem %s81_s1, 1024  ;;  %p1769_p8 = scmp.lt.s32.totalorder %s81_s1, %s81_s1 }
  0x4e   :  { %p1765_p7 = scmp.ne.s32.totalorder %s81_s1, %s1764_s23  ;;  %p1770_p9 = scmp.lt.s32.totalorder %s1764_s23, %s1764_s23 }
  0x50   :  { %p1771_p10 = por %p1770_p9, %p1769_p8 }
  0x52   :  { %p1772_p11 = pnand %p1771_p10, %p1765_p7 }
  0x54   :  { %1775 = shalt.err (!%p1772_p11)
}
  0x55   :  { %86 = dma.hbm_to_vmem [thread:$0]  %s2076_s7, 1024, %s81_s1, [#allocation10], %s1831_s27, %s1831_s27, %s1832_s28  }
  0x56   :  { %s1839_s18 = smov [#allocation12]   ;;  %s1776_s29 = scalar_lea.hbm %s2078_s9, 6144 }
  0x57   :  { %s94_s24 = sshll.u32 %s1839_s18, 4  ;;  %p1777_p12 = scmp.ne.s32.totalorder %s2078_s9, %s1776_s29  ;;  %s95_s24 = int_to_ptr.vmem [resolvable:$true] %s94_s24 }
  0x58   :  { %p1780_p13 = scmp.lt.u32.totalorder %s1776_s29, %s2078_s9 }
  0x5a   :  { %p1782_p0 = pnand %p1780_p13, %p1777_p12 }
  0x5c   :  { %1785 = shalt.err (!%p1782_p0)
}
  0x5d   :  { %s1786_s14 = scalar_lea.vmem %s95_s24, 6144  ;;  %p1791_p2 = scmp.lt.s32.totalorder %s95_s24, %s95_s24 }
  0x5e   :  { %p1787_p1 = scmp.ne.s32.totalorder %s95_s24, %s1786_s14  ;;  %p1792_p3 = scmp.lt.s32.totalorder %s1786_s14, %s1786_s14 }
  0x60   :  { %p1793_p4 = por %p1792_p3, %p1791_p2 }
  0x62   :  { %p1794_p5 = pnand %p1793_p4, %p1787_p1 }
  0x64   :  { %1797 = shalt.err (!%p1794_p5)
}
  0x65   :  { %s1840_s7 = smov 384   ;;  %s1841_s27 = smov 24  }
  0x66   :  { %100 = dma.hbm_to_vmem [thread:$0]  %s2078_s9, 6144, %s95_s24, [#allocation13], %s1840_s7, %s1840_s7, %s1841_s27  }
  0x67   :  { %1820 = dma.done.wait [#allocation4], 256  }
  0x68   :  { %1821 = vsyncadd [#allocation4], 4294967040 }
  0x69   :  { %1822 = dma.done.wait [#allocation7], 3072  }
  0x6a   :  { %1823 = vsyncadd [#allocation7], 4294964224 }
  0x6b   :  { %1824 = dma.done.wait [#allocation10], 2048  }
  0x6c   :  { %1825 = vsyncadd [#allocation10], 4294965248 }
  0x6d   :  { %1826 = dma.done.wait [#allocation13], 6144  }
  0x6e   :  { %1827 = vsyncadd [#allocation13], 4294961152  ;;  %v1842_v0 = vmov 0.0   ;;  %v1503_v1 = vld [vmem:[#allocation6 + $0x40] sm:$0xff]   ;;  %v1505_v3 = vld [vmem:[#allocation6 + $0x48] sm:$0xff]   ;;  %vm1843_vm0 = vmmov 0  }
  0x6f   :  { %1427 = vmatprep.subr.bf16.mxu1 %v1842_v0  ;;  %v1504_v2 = vld [vmem:[#allocation6] sm:$0xff]   ;;  %1378 = vmatprep.subr.bf16.mxu0 %v1503_v1  ;;  %v1506_v4 = vld [vmem:[#allocation6 + $0x8] sm:$0xff]   ;;  %v1507_v5 = vld [vmem:[#allocation6 + $0x50] sm:$0xff]  }
  0x70   :  { %1379 = vmatpush3.bf16.msra.mxu0 %v1504_v2  ;;  %v1508_v6 = vld [vmem:[#allocation6 + $0x10] sm:$0xff]   ;;  %v1509_v7 = vld [vmem:[#allocation6 + $0x58] sm:$0xff]   ;;  %v1511_v9 = vld [vmem:[#allocation6 + $0x60] sm:$0xff]   ;;  %1443 = vmatprep.mubr.msk.bf16.mxu1 %vm1843_vm0, %v1842_v0 }
  0x71   :  { %1380 = vmatprep.subr.bf16.mxu0 %v1505_v3  ;;  %v1510_v8 = vld [vmem:[#allocation6 + $0x18] sm:$0xff]   ;;  %v1512_v10 = vld [vmem:[#allocation6 + $0x20] sm:$0xff]   ;;  %v1513_v11 = vld [vmem:[#allocation6 + $0x68] sm:$0xff]  }
  0x72   :  { %v1514_v12 = vld [vmem:[#allocation6 + $0x28] sm:$0xff]   ;;  %v1521_v13 = vld [vmem:[#allocation3 + $0x4] ss:$8 sps:$4 sm:$0xff]   ;;  %v1522_v14 = vld [vmem:[#allocation8] sm:$0xff]  }
  0x73   :  { %v1515_v15 = vld [vmem:[#allocation6 + $0x70] sm:$0xff]   ;;  %302 = vmatprep.mubr.bf16.mxu0 %v1521_v13  ;;  %1428 = vmatpush3.bf16.msra.mxu1 %v1522_v14  ;;  %v1523_v16 = vld [vmem:[#allocation8 + $0x8] sm:$0xff]   ;;  %v1517_v18 = vld [vmem:[#allocation6 + $0x78] sm:$0xff]  }
  0x74   :  { %1381 = vmatpush3.bf16.msra.mxu0 %v1506_v4  ;;  %v1516_v17 = vld [vmem:[#allocation6 + $0x30] sm:$0xff]   ;;  %1429 = vmatprep.subr.bf16.mxu1 %v1842_v0  ;;  %v1518_v20 = vld [vmem:[#allocation6 + $0x38] sm:$0xff]   ;;  %v1526_v23 = vld [vmem:[#allocation8 + $0x20] sm:$0xff]  }
  0x75   :  { %1382 = vmatprep.subr.bf16.mxu0 %v1507_v5  ;;  %v1524_v19 = vld [vmem:[#allocation8 + $0x10] sm:$0xff]   ;;  %v1525_v21 = vld [vmem:[#allocation8 + $0x18] sm:$0xff]   ;;  %v1527_v24 = vld [vmem:[#allocation8 + $0x28] sm:$0xff]  }
  0x76   :  { %v1519_v22 = vld [vmem:[#allocation3] ss:$8 sps:$4 sm:$0xff]   ;;  %v1530_v27 = vld [vmem:[#allocation9] sm:$0xff]   ;;  %v1531_v28 = vld [vmem:[#allocation9 + $0x8] sm:$0xff]  }
  0x77   :  { %1430 = vmatpush3.bf16.msra.mxu1 %v1523_v16  ;;  %v1528_v25 = vld [vmem:[#allocation8 + $0x30] sm:$0xff]   ;;  %v1529_v26 = vld [vmem:[#allocation8 + $0x38] sm:$0xff]   ;;  %v1534_v31 = vld [vmem:[#allocation9 + $0x20] sm:$0xff]  }
  0x78   :  { %1383 = vmatpush3.bf16.msra.mxu0 %v1508_v6  ;;  %1431 = vmatprep.subr.bf16.mxu1 %v1842_v0  ;;  %v1532_v29 = vld [vmem:[#allocation9 + $0x10] sm:$0xff]   ;;  %v1533_v30 = vld [vmem:[#allocation9 + $0x18] sm:$0xff]   ;;  %v1535_v32 = vld [vmem:[#allocation9 + $0x28] sm:$0xff]  }
  0x79   :  { %1384 = vmatprep.subr.bf16.mxu0 %v1509_v7  ;;  %v1278_v35 = vld [vmem:[%s2071_s2] ss:$0 sm:$0xff]  ;;  %v1537_v46 = vld [vmem:[#allocation9 + $0x38] sm:$0xff]   ;;  %v1538_v47 = vld [vmem:[#allocation11] sm:$0xff]  }
  0x7a   :  { %v1536_v45 = vld [vmem:[#allocation9 + $0x30] sm:$0xff]   ;;  %v1539_v48 = vld [vmem:[#allocation11 + $0x8] sm:$0xff]   ;;  %v1541_v50 = vld [vmem:[#allocation11 + $0x18] sm:$0xff]  }
  0x7b   :  { %1432 = vmatpush3.bf16.msra.mxu1 %v1524_v19  ;;  %v1540_v49 = vld [vmem:[#allocation11 + $0x10] sm:$0xff]   ;;  %v1542_v51 = vld [vmem:[#allocation11 + $0x20] sm:$0xff]   ;;  %v1543_v52 = vld [vmem:[#allocation11 + $0x28] sm:$0xff]  }
  0x7c   :  { %1385 = vmatpush3.bf16.msra.mxu0 %v1510_v8  ;;  %1433 = vmatprep.subr.bf16.mxu1 %v1842_v0  ;;  %v1279_v53 = vld [vmem:[%s2073_s4] ss:$0 sm:$0xff]  ;;  %v1545_v1 = vld [vmem:[#allocation11 + $0x38] sm:$0xff]   ;;  %v1551_v4 = vld [vmem:[#allocation12 + $0xc] ss:$24 sps:$4 sm:$0xff]  }
  0x7d   :  { %1386 = vmatprep.subr.bf16.mxu0 %v1511_v9  ;;  %v1544_v63 = vld [vmem:[#allocation11 + $0x30] sm:$0xff]   ;;  %v1546_v2 = vld [vmem:[#allocation12] ss:$24 sps:$4 sm:$0xff]   ;;  %v1548_v3 = vld [vmem:[#allocation12 + $0x4] ss:$24 sps:$4 sm:$0xff]  }
  0x7e   :  { %v1554_v5 = vld [vmem:[#allocation12 + $0x34] ss:$24 sps:$4 sm:$0xff]   ;;  %v1552_v6 = vld [vmem:[#allocation12 + $0x30] ss:$24 sps:$4 sm:$0xff]   ;;  %v1560_v7 = vld [vmem:[#allocation12 + $0x64] ss:$24 sps:$4 sm:$0xff]  }
  0x7f   :  { %1434 = vmatpush3.bf16.msra.mxu1 %v1525_v21  ;;  %v1558_v8 = vld [vmem:[#allocation12 + $0x60] ss:$24 sps:$4 sm:$0xff]   ;;  %v1566_v9 = vld [vmem:[#allocation12 + $0x94] ss:$24 sps:$4 sm:$0xff]   ;;  %v1576_v13 = vld [vmem:[#allocation12 + $0xf0] ss:$24 sps:$4 sm:$0xff]  }
  0x80   :  { %1387 = vmatpush3.bf16.msra.mxu0 %v1512_v10  ;;  %1435 = vmatprep.subr.bf16.mxu1 %v1842_v0  ;;  %v1564_v10 = vld [vmem:[#allocation12 + $0x90] ss:$24 sps:$4 sm:$0xff]  }
  0x81   :  { %1388 = vmatprep.subr.bf16.mxu0 %v1513_v11  ;;  %v1570_v11 = vld [vmem:[#allocation12 + $0xc0] ss:$24 sps:$4 sm:$0xff]   ;;  %v1288_v14 = vld [vmem:[%s2075_s6] ss:$0 sm:$0xff] }
  0x83   :  { %1436 = vmatpush3.bf16.msra.mxu1 %v1526_v23  ;;  %v1549_v23 = vld [vmem:[#allocation12 + $0x8] ss:$24 sps:$4 sm:$0xff]  }
  0x84   :  { %1389 = vmatpush3.bf16.msra.mxu0 %v1514_v12  ;;  %1437 = vmatprep.subr.bf16.mxu1 %v1842_v0  ;;  %v1578_v12 = vld [vmem:[#allocation12 + $0xf4] ss:$24 sps:$4 sm:$0xff]  }
  0x85   :  { %1390 = vmatprep.subr.bf16.mxu0 %v1515_v15 }
  0x87   :  { %1438 = vmatpush3.bf16.msra.mxu1 %v1527_v24 }
  0x88   :  { %1391 = vmatpush3.bf16.msra.mxu0 %v1516_v17  ;;  %1439 = vmatprep.subr.bf16.mxu1 %v1842_v0 }
  0x89   :  { %1392 = vmatprep.subr.bf16.mxu0 %v1517_v18 }
  0x8b   :  { %1440 = vmatpush3.bf16.msra.mxu1 %v1528_v25  ;;  %v1557_v25 = vld [vmem:[#allocation12 + $0x3c] ss:$24 sps:$4 sm:$0xff]  }
  0x8c   :  { %1393 = vmatpush3.bf16.msra.mxu0 %v1518_v20  ;;  %1441 = vmatprep.subr.bf16.mxu1 %v1842_v0 }
  0x8d   :  { %1447 = vmatprep.subr.bf16.mxu0 %v1842_v0 }
  0x8f   :  { %303 = vmatmul.mubr.bf16.vlgmr.msra.gmra.mrb[0].mxu0 %v1519_v22  ;;  %1442 = vmatpush3.bf16.msra.mxu1 %v1529_v26  ;;  %v1555_v26 = vld [vmem:[#allocation12 + $0x38] ss:$24 sps:$4 sm:$0xff]  }
  0x90   :  { %1463 = vmatprep.mubr.msk.bf16.mxu0 %vm1843_vm0, %v1842_v0  ;;  %1467 = vmatprep.subr.bf16.mxu1 %v1842_v0 }
  0x91   :  { %1448 = vmatpush3.bf16.msra.mxu0 %v1530_v27  ;;  %v1563_v27 = vld [vmem:[#allocation12 + $0x6c] ss:$24 sps:$4 sm:$0xff]  }
  0x92   :  { %1449 = vmatprep.subr.bf16.mxu0 %v1842_v0 }
  0x95   :  { %1450 = vmatpush3.bf16.msra.mxu0 %v1531_v28  ;;  %v1561_v28 = vld [vmem:[#allocation12 + $0x68] ss:$24 sps:$4 sm:$0xff]  }
  0x96   :  { %1451 = vmatprep.subr.bf16.mxu0 %v1842_v0 }
  0x99   :  { %1452 = vmatpush3.bf16.msra.mxu0 %v1532_v29  ;;  %v1569_v29 = vld [vmem:[#allocation12 + $0x9c] ss:$24 sps:$4 sm:$0xff]  }
  0x9a   :  { %1453 = vmatprep.subr.bf16.mxu0 %v1842_v0 }
  0x9d   :  { %1454 = vmatpush3.bf16.msra.mxu0 %v1533_v30  ;;  %v1567_v30 = vld [vmem:[#allocation12 + $0x98] ss:$24 sps:$4 sm:$0xff]  }
  0x9e   :  { %1455 = vmatprep.subr.bf16.mxu0 %v1842_v0 }
  0xa1   :  { %1456 = vmatpush3.bf16.msra.mxu0 %v1534_v31  ;;  %v1575_v31 = vld [vmem:[#allocation12 + $0xcc] ss:$24 sps:$4 sm:$0xff]  }
  0xa2   :  { %1457 = vmatprep.subr.bf16.mxu0 %v1842_v0 }
  0xa5   :  { %1458 = vmatpush3.bf16.msra.mxu0 %v1535_v32  ;;  %v1573_v32 = vld [vmem:[#allocation12 + $0xc8] ss:$24 sps:$4 sm:$0xff]  }
  0xa6   :  { %1459 = vmatprep.subr.bf16.mxu0 %v1842_v0 }
  0xa9   :  { %1460 = vmatpush3.bf16.msra.mxu0 %v1536_v45  ;;  %v1297_v45 = vld [vmem:[%s2077_s8] ss:$0 sm:$0xff] }
  0xaa   :  { %1461 = vmatprep.subr.bf16.mxu0 %v1842_v0 }
  0xad   :  { %1462 = vmatpush3.bf16.msra.mxu0 %v1537_v46 }
  0xae   :  { %997 = vmatprep.subr.bf16.mxu0 %v1548_v3  ;;  %v1614_v3 = vld [vmem:[#allocation12 + $0x134] ss:$24 sps:$4 sm:$0xff]  }
 0x162   :  { %v1394_v33 = vpop.f32.mrb[0].mxu0 }
 0x163   :  { %v1395_v34 = vpop.f32.mrb[1].mxu0 }
 0x164   :  { %v1396_v36 = vadd.f32 %v1395_v34, %v1394_v33  ;;  %v1397_v37 = vpop.f32.mrb[2].mxu0  ;;  %v1581_v33 = vld [vmem:[#allocation12 + $0xfc] ss:$24 sps:$4 sm:$0xff]   ;;  %v1579_v34 = vld [vmem:[#allocation12 + $0xf8] ss:$24 sps:$4 sm:$0xff]  }
 0x165   :  { %v1398_v38 = vpop.f32.mrb[3].mxu0 }
 0x166   :  { %v327_v39 = vadd.f32 %v1396_v36, %v1278_v35  ;;  %v1399_v40 = vadd.f32 %v1398_v38, %v1397_v37  ;;  %v1582_v36 = vld [vmem:[#allocation12 + $0x120] ss:$24 sps:$4 sm:$0xff]   ;;  %v1587_v37 = vld [vmem:[#allocation12 + $0x12c] ss:$24 sps:$4 sm:$0xff]  }
 0x167   :  { %v1585_v38 = vld [vmem:[#allocation12 + $0x128] ss:$24 sps:$4 sm:$0xff]  }
 0x168   :  { %v328_v41 = vadd.f32 %v1399_v40, %v1278_v35  ;;  %v329_v42 = vmax.f32 %v327_v39, 0.0  ;;  %v1584_v35 = vld [vmem:[#allocation12 + $0x124] ss:$24 sps:$4 sm:$0xff]   ;;  %v1590_v39 = vld [vmem:[#allocation12 + $0x154] ss:$24 sps:$4 sm:$0xff]  }
 0x169   :  { %v1588_v40 = vld [vmem:[#allocation12 + $0x150] ss:$24 sps:$4 sm:$0xff]  }
 0x16a   :  { %v330_v43 = vmax.f32 %v328_v41, 0.0  ;;  %v1593_v41 = vld [vmem:[#allocation12 + $0x15c] ss:$24 sps:$4 sm:$0xff]  }
 0x16c   :  { %v331_v44 = vpack.c.bf16 %v330_v43, %v329_v42  ;;  %v1591_v42 = vld [vmem:[#allocation12 + $0x158] ss:$24 sps:$4 sm:$0xff]   ;;  %v1596_v43 = vld [vmem:[#allocation12 + $0x14] ss:$24 sps:$4 sm:$0xff]  }
 0x16e   :  { %1444 = vmatmul.mubr.bf16.vlgmr.msra.gmra.mrb[0].mxu1 %v331_v44  ;;  %v1844_v44 = vmov 0  }
 0x16f   :  { %1483 = vmatprep.mubr.msk.bf16.mxu1 %vm1843_vm0, %v1842_v0  ;;  %1468 = vmatpush3.bf16.msra.mxu1 %v1538_v47 }
 0x170   :  { %1469 = vmatprep.subr.bf16.mxu1 %v1842_v0 }
 0x173   :  { %1470 = vmatpush3.bf16.msra.mxu1 %v1539_v48 }
 0x174   :  { %1471 = vmatprep.subr.bf16.mxu1 %v1842_v0 }
 0x177   :  { %1472 = vmatpush3.bf16.msra.mxu1 %v1540_v49 }
 0x178   :  { %1473 = vmatprep.subr.bf16.mxu1 %v1842_v0 }
 0x17b   :  { %1474 = vmatpush3.bf16.msra.mxu1 %v1541_v50 }
 0x17c   :  { %1475 = vmatprep.subr.bf16.mxu1 %v1842_v0 }
 0x17f   :  { %1476 = vmatpush3.bf16.msra.mxu1 %v1542_v51 }
 0x180   :  { %1477 = vmatprep.subr.bf16.mxu1 %v1842_v0 }
 0x183   :  { %1478 = vmatpush3.bf16.msra.mxu1 %v1543_v52 }
 0x184   :  { %1479 = vmatprep.subr.bf16.mxu1 %v1842_v0 }
 0x187   :  { %1480 = vmatpush3.bf16.msra.mxu1 %v1544_v63  ;;  %v1606_v63 = vld [vmem:[#allocation12 + $0xd0] ss:$24 sps:$4 sm:$0xff]  }
 0x188   :  { %1481 = vmatprep.subr.bf16.mxu1 %v1842_v0  ;;  %v1572_v0 = vld [vmem:[#allocation12 + $0xc4] ss:$24 sps:$4 sm:$0xff]  }
 0x18b   :  { %1482 = vmatpush3.bf16.msra.mxu1 %v1545_v1  ;;  %v1611_v1 = vld [vmem:[#allocation12 + $0x104] ss:$24 sps:$4 sm:$0xff]  }
 0x18c   :  { %1040 = vmatprep.subr.bf16.mxu1 %v1551_v4  ;;  %v1612_v4 = vld [vmem:[#allocation12 + $0x130] ss:$24 sps:$4 sm:$0xff]  }
 0x241   :  { %v437_v54 = vpop.f32.mrb[0].mxu1 }
 0x242   :  { %v438_v55 = vadd.f32 %v1279_v53, %v437_v54  ;;  %v1445_v56 = vpop.f32.mrb[1].mxu1  ;;  %v1594_v54 = vld [vmem:[#allocation12 + $0x10] ss:$24 sps:$4 sm:$0xff]  }
 0x243   :  { %v440_v57 = vpop.f32.mrb[2].mxu1  ;;  %v1599_v56 = vld [vmem:[#allocation12 + $0x44] ss:$24 sps:$4 sm:$0xff]  }
 0x244   :  { %v441_v58 = vadd.f32 %v1279_v53, %v440_v57  ;;  %v1446_v59 = vpop.f32.mrb[3].mxu1  ;;  %v444_v60 = vmax.f32 %v438_v55, 0.0  ;;  %v1597_v57 = vld [vmem:[#allocation12 + $0x40] ss:$24 sps:$4 sm:$0xff]  }
 0x245   :  { %v1600_v59 = vld [vmem:[#allocation12 + $0x70] ss:$24 sps:$4 sm:$0xff]  }
 0x246   :  { %v445_v61 = vmax.f32 %v441_v58, 0.0  ;;  %v1602_v58 = vld [vmem:[#allocation12 + $0x74] ss:$24 sps:$4 sm:$0xff]  }
 0x248   :  { %v446_v62 = vpack.c.bf16 %v445_v61, %v444_v60  ;;  %v1605_v60 = vld [vmem:[#allocation12 + $0xa4] ss:$24 sps:$4 sm:$0xff]   ;;  %v1603_v61 = vld [vmem:[#allocation12 + $0xa0] ss:$24 sps:$4 sm:$0xff]  }
 0x24a   :  { %1464 = vmatmul.mubr.bf16.vlgmr.msra.gmra.mrb[4].mxu0 %v446_v62  ;;  %v1608_v62 = vld [vmem:[#allocation12 + $0xd4] ss:$24 sps:$4 sm:$0xff]  }
 0x24b   :  { %998 = vmatpush1.bf16.msra.mxu0 %v1546_v2  ;;  %1029 = vmatprep.mubr.bf16.mxu0 %v1844_v44  ;;  %v1609_v2 = vld [vmem:[#allocation12 + $0x100] ss:$24 sps:$4 sm:$0xff]  }
 0x24c   :  { %999 = vmatprep.subr.bf16.mxu0 %v1554_v5  ;;  %v1617_v5 = vld [vmem:[#allocation12 + $0x164] ss:$24 sps:$4 sm:$0xff]  }
 0x24f   :  { %1000 = vmatpush1.bf16.msra.mxu0 %v1552_v6  ;;  %v1615_v6 = vld [vmem:[#allocation12 + $0x160] ss:$24 sps:$4 sm:$0xff]  }
 0x250   :  { %1001 = vmatprep.subr.bf16.mxu0 %v1560_v7  ;;  %v727_v7 = vlaneseq }
 0x253   :  { %1002 = vmatpush1.bf16.msra.mxu0 %v1558_v8  ;;  %v2035_v8 = vshrl.u32 %v727_v7, 7 }
 0x254   :  { %1003 = vmatprep.subr.bf16.mxu0 %v1566_v9 }
 0x255   :  { %v729_v9 = vsub.s32 0, %v2035_v8 }
 0x257   :  { %1004 = vmatpush1.bf16.msra.mxu0 %v1564_v10  ;;  %v737_v10 = vsub.s32 2, %v2035_v8 }
 0x258   :  { %1005 = vmatprep.subr.bf16.mxu0 %v1572_v0  ;;  %v2042_v0 = vld [vmem:[%s2079_s10] sm:$0x3f]  ;;  %s1845_s10 = smov [#allocation14]  }
 0x259   :  { %s1245_s20 = sshll.u32 %s1845_s10, 4  ;;  %s1246_s20 = int_to_ptr.vmem [resolvable:$true] %s1245_s20 }
 0x25a   :  { %s1798_s21 = scalar_lea.vmem %s1246_s20, 768  ;;  %p1803_p7 = scmp.lt.s32.totalorder %s1246_s20, %s1246_s20 }
 0x25b   :  { %1006 = vmatpush1.bf16.msra.mxu0 %v1570_v11  ;;  %v733_v11 = vsub.s32 1, %v2035_v8  ;;  %p1799_p6 = scmp.ne.s32.totalorder %s1246_s20, %s1798_s21  ;;  %p1804_p8 = scmp.lt.s32.totalorder %s1798_s21, %s1798_s21 }
 0x25c   :  { %1007 = vmatprep.subr.bf16.mxu0 %v1578_v12  ;;  %v741_v12 = vsub.s32 3, %v2035_v8 }
 0x25d   :  { %p1805_p9 = por %p1804_p8, %p1803_p7 }
 0x25f   :  { %1008 = vmatpush1.bf16.msra.mxu0 %v1576_v13  ;;  %v730_v13 = vrot.slane %v2042_v0, %v729_v9  ;;  %p1806_p10 = pnand %p1805_p9, %p1799_p6 }
 0x260   :  { %1009 = vmatprep.subr.bf16.mxu0 %v1584_v35 }
 0x263   :  { %1010 = vmatpush1.bf16.msra.mxu0 %v1582_v36 }
 0x264   :  { %1011 = vmatprep.subr.bf16.mxu0 %v1590_v39 }
 0x267   :  { %1012 = vmatpush1.bf16.msra.mxu0 %v1588_v40 }
 0x268   :  { %1083 = vmatprep.subr.bf16.mxu0 %v1596_v43 }
 0x31d   :  { %v552_v15 = vpop.f32.mrb[4].mxu0 }
 0x31e   :  { %v553_v16 = vadd.f32 %v1288_v14, %v552_v15  ;;  %v1465_v17 = vpop.f32.mrb[5].mxu0  ;;  %v734_v15 = vrot.slane %v2042_v0, %v733_v11 }
 0x31f   :  { %v555_v18 = vpop.f32.mrb[6].mxu0 }
 0x320   :  { %v556_v19 = vadd.f32 %v1288_v14, %v555_v18  ;;  %v1466_v20 = vpop.f32.mrb[7].mxu0  ;;  %v559_v21 = vmax.f32 %v553_v16, 0.0  ;;  %v738_v14 = vrot.slane %v2042_v0, %v737_v10  ;;  %v742_v16 = vrot.slane %v2042_v0, %v741_v12 }
 0x322   :  { %v560_v22 = vmax.f32 %v556_v19, 0.0 }
 0x324   :  { %v561_v24 = vpack.c.bf16 %v560_v22, %v559_v21 }
 0x326   :  { %1484 = vmatmul.mubr.bf16.vlgmr.msra.gmra.mrb[4].mxu1 %v561_v24 }
 0x327   :  { %1041 = vmatpush1.bf16.msra.mxu1 %v1549_v23  ;;  %1072 = vmatprep.mubr.bf16.mxu1 %v1844_v44 }
 0x328   :  { %1042 = vmatprep.subr.bf16.mxu1 %v1557_v25 }
 0x32b   :  { %1043 = vmatpush1.bf16.msra.mxu1 %v1555_v26 }
 0x32c   :  { %1044 = vmatprep.subr.bf16.mxu1 %v1563_v27 }
 0x32f   :  { %1045 = vmatpush1.bf16.msra.mxu1 %v1561_v28 }
 0x330   :  { %1046 = vmatprep.subr.bf16.mxu1 %v1569_v29 }
 0x333   :  { %1047 = vmatpush1.bf16.msra.mxu1 %v1567_v30 }
 0x334   :  { %1048 = vmatprep.subr.bf16.mxu1 %v1575_v31 }
 0x337   :  { %1049 = vmatpush1.bf16.msra.mxu1 %v1573_v32 }
 0x338   :  { %1050 = vmatprep.subr.bf16.mxu1 %v1581_v33 }
 0x33b   :  { %1051 = vmatpush1.bf16.msra.mxu1 %v1579_v34 }
 0x33c   :  { %1052 = vmatprep.subr.bf16.mxu1 %v1587_v37 }
 0x33f   :  { %1053 = vmatpush1.bf16.msra.mxu1 %v1585_v38 }
 0x340   :  { %1054 = vmatprep.subr.bf16.mxu1 %v1593_v41 }
 0x343   :  { %1055 = vmatpush1.bf16.msra.mxu1 %v1591_v42 }
 0x3f9   :  { %v667_v46 = vpop.f32.mrb[4].mxu1 }
 0x3fa   :  { %v668_v47 = vadd.f32 %v1297_v45, %v667_v46  ;;  %v1485_v48 = vpop.f32.mrb[5].mxu1 }
 0x3fb   :  { %v670_v49 = vpop.f32.mrb[6].mxu1 }
 0x3fc   :  { %v671_v50 = vadd.f32 %v1297_v45, %v670_v49  ;;  %v1486_v51 = vpop.f32.mrb[7].mxu1  ;;  %v674_v52 = vmax.f32 %v668_v47, 0.0 }
 0x3fe   :  { %v675_v53 = vmax.f32 %v671_v50, 0.0 }
 0x400   :  { %v676_v55 = vpack.c.bf16 %v675_v53, %v674_v52 }
 0x402   :  { %1030 = vmatmul.mubr.bf16.vlgmr.msra.gmra.mrb[8].mxu0 %v676_v55  ;;  %1073 = vmatmul.mubr.bf16.vlgmr.msra.gmra.mrb[8].mxu1 %v676_v55 }
 0x403   :  { %1084 = vmatpush1.bf16.msra.mxu0 %v1594_v54  ;;  %1115 = vmatprep.mubr.bf16.mxu0 %v1844_v44 }
 0x404   :  { %1085 = vmatprep.subr.bf16.mxu0 %v1599_v56 }
 0x407   :  { %1086 = vmatpush1.bf16.msra.mxu0 %v1597_v57  ;;  %v745_v57 = vsub.s32 4, %v2035_v8 }
 0x408   :  { %1087 = vmatprep.subr.bf16.mxu0 %v1602_v58  ;;  %v749_v58 = vsub.s32 5, %v2035_v8 }
 0x40b   :  { %1088 = vmatpush1.bf16.msra.mxu0 %v1600_v59 }
 0x40c   :  { %1089 = vmatprep.subr.bf16.mxu0 %v1605_v60 }
 0x40f   :  { %1090 = vmatpush1.bf16.msra.mxu0 %v1603_v61  ;;  %v746_v61 = vrot.slane %v2042_v0, %v745_v57 }
 0x410   :  { %1091 = vmatprep.subr.bf16.mxu0 %v1608_v62 }
 0x413   :  { %1092 = vmatpush1.bf16.msra.mxu0 %v1606_v63  ;;  %v750_v63 = vrot.slane %v2042_v0, %v749_v58 }
 0x414   :  { %1093 = vmatprep.subr.bf16.mxu0 %v1611_v1 }
 0x417   :  { %1094 = vmatpush1.bf16.msra.mxu0 %v1609_v2 }
 0x418   :  { %1095 = vmatprep.subr.bf16.mxu0 %v1614_v3 }
 0x41b   :  { %1096 = vmatpush1.bf16.msra.mxu0 %v1612_v4 }
 0x41c   :  { %1097 = vmatprep.subr.bf16.mxu0 %v1617_v5 }
 0x41f   :  { %1098 = vmatpush1.bf16.msra.mxu0 %v1615_v6 }
 0x422   :  { %1116 = vmatmul.mubr.bf16.vlgmr.msra.gmra.mrb[12].mxu0 %v676_v55 }
 0x4d5   :  { %v1031_v17 = vpop.f32.mrb[8].mxu0  ;;  %v1074_v18 = vpop.f32.mrb[8].mxu1 }
 0x4d6   :  { %v1032_v19 = vadd.f32 %v1031_v17, %v730_v13  ;;  %v1075_v20 = vadd.f32 %v1074_v18, %v738_v14  ;;  %v1033_v21 = vpop.f32.mrb[9].mxu0  ;;  %v1076_v22 = vpop.f32.mrb[9].mxu1 }
 0x4d7   :  { %v1034_v23 = vadd.f32 %v1033_v21, %v734_v15  ;;  %v1077_v24 = vadd.f32 %v1076_v22, %v742_v16  ;;  %v1035_v25 = vpop.f32.mrb[10].mxu0  ;;  %v1078_v26 = vpop.f32.mrb[10].mxu1 }
 0x4d8   :  { %v1354_v27 = vmul.f32 -1.442695, %v1032_v19  ;;  %v1356_v28 = vmul.f32 -1.442695, %v1075_v20  ;;  %v1036_v29 = vadd.f32 %v1035_v25, %v730_v13  ;;  %v1079_v30 = vadd.f32 %v1078_v26, %v738_v14  ;;  %v1037_v31 = vpop.f32.mrb[11].mxu0  ;;  %v1080_v32 = vpop.f32.mrb[11].mxu1 }
 0x4d9   :  { %v1355_v33 = vmul.f32 -1.442695, %v1034_v23  ;;  %v1357_v34 = vmul.f32 -1.442695, %v1077_v24  ;;  %v1038_v35 = vadd.f32 %v1037_v31, %v734_v15  ;;  %v1081_v36 = vadd.f32 %v1080_v32, %v742_v16 }
 0x4da   :  { %1618 = vpow2.f32 %v1354_v27  ;;  %v1360_v37 = vmul.f32 -1.442695, %v1036_v29  ;;  %v1362_v38 = vmul.f32 -1.442695, %v1079_v30 }
 0x4db   :  { %1620 = vpow2.f32 %v1356_v28  ;;  %v1361_v39 = vmul.f32 -1.442695, %v1038_v35  ;;  %v1363_v40 = vmul.f32 -1.442695, %v1081_v36 }
 0x4dc   :  { %1622 = vpow2.f32 %v1355_v33 }
 0x4dd   :  { %1624 = vpow2.f32 %v1357_v34 }
 0x4de   :  { %1626 = vpow2.f32 %v1360_v37 }
 0x4df   :  { %1628 = vpow2.f32 %v1362_v38 }
 0x4e0   :  { %1630 = vpow2.f32 %v1361_v39 }
 0x4e1   :  { %1632 = vpow2.f32 %v1363_v40 }
 0x4e4   :  { %v1619_v41 = vpop.eup %1618 }
 0x4e5   :  { %v1621_v42 = vpop.eup %1620  ;;  %v1162_v43 = vadd.f32 1.0, %v1619_v41 }
 0x4e6   :  { %v1623_v44 = vpop.eup %1622  ;;  %v1164_v45 = vadd.f32 1.0, %v1621_v42 }
 0x4e7   :  { %v1625_v46 = vpop.eup %1624  ;;  %1634 = vrcp.f32 %v1162_v43  ;;  %v1163_v47 = vadd.f32 1.0, %v1623_v44 }
 0x4e8   :  { %v1627_v48 = vpop.eup %1626  ;;  %1636 = vrcp.f32 %v1164_v45  ;;  %v1165_v49 = vadd.f32 1.0, %v1625_v46 }
 0x4e9   :  { %v1629_v50 = vpop.eup %1628  ;;  %1638 = vrcp.f32 %v1163_v47  ;;  %v1168_v51 = vadd.f32 1.0, %v1627_v48 }
 0x4ea   :  { %v1631_v52 = vpop.eup %1630  ;;  %1640 = vrcp.f32 %v1165_v49  ;;  %v1170_v53 = vadd.f32 1.0, %v1629_v50 }
 0x4eb   :  { %v1633_v54 = vpop.eup %1632  ;;  %1642 = vrcp.f32 %v1168_v51  ;;  %v1169_v55 = vadd.f32 1.0, %v1631_v52 }
 0x4ec   :  { %1644 = vrcp.f32 %v1170_v53  ;;  %v1171_v56 = vadd.f32 1.0, %v1633_v54 }
 0x4ed   :  { %1646 = vrcp.f32 %v1169_v55 }
 0x4ee   :  { %1648 = vrcp.f32 %v1171_v56 }
 0x4f1   :  { %v1635_v59 = vpop.eup %1634 }
 0x4f2   :  { %v1637_v60 = vpop.eup %1636 }
 0x4f3   :  { %v1639_v62 = vpop.eup %1638 }
 0x4f4   :  { %v1641_v1 = vpop.eup %1640  ;;  %v1372_v2 = vpack.c.bf16 %v1639_v62, %v1635_v59 }
 0x4f5   :  { %v1643_v3 = vpop.eup %1642  ;;  %v1373_v4 = vpack.c.bf16 %v1641_v1, %v1637_v60  ;;  %v1117_v5 = vpop.f32.mrb[12].mxu0 }
 0x4f6   :  { %v1645_v6 = vpop.eup %1644  ;;  %1234 = vst [vmem:[#allocation14] sm:$0xff] %v1372_v2  ;;  %v1118_v7 = vadd.f32 %v1117_v5, %v746_v61  ;;  %v1119_v9 = vpop.f32.mrb[13].mxu0 }
 0x4f7   :  { %v1647_v10 = vpop.eup %1646  ;;  %1235 = vst [vmem:[#allocation14 + $0x8] sm:$0xff] %v1373_v4  ;;  %v1120_v11 = vadd.f32 %v1119_v9, %v750_v63  ;;  %v1121_v8 = vpop.f32.mrb[14].mxu0 }
 0x4f8   :  { %v1649_v12 = vpop.eup %1648  ;;  %v1375_v13 = vpack.c.bf16 %v1647_v10, %v1643_v3  ;;  %v1358_v14 = vmul.f32 -1.442695, %v1118_v7  ;;  %v1122_v15 = vadd.f32 %v1121_v8, %v746_v61  ;;  %v1123_v16 = vpop.f32.mrb[15].mxu0 }
 0x4f9   :  { %v1376_v17 = vpack.c.bf16 %v1649_v12, %v1645_v6  ;;  %v1359_v0 = vmul.f32 -1.442695, %v1120_v11  ;;  %v1124_v18 = vadd.f32 %v1123_v16, %v750_v63 }
 0x4fa   :  { %1237 = vst [vmem:[#allocation14 + $0x18] sm:$0xff] %v1375_v13  ;;  %1650 = vpow2.f32 %v1358_v14  ;;  %v1364_v19 = vmul.f32 -1.442695, %v1122_v15 }
 0x4fb   :  { %1238 = vst [vmem:[#allocation14 + $0x20] sm:$0xff] %v1376_v17  ;;  %1652 = vpow2.f32 %v1359_v0  ;;  %v1365_v20 = vmul.f32 -1.442695, %v1124_v18 }
 0x4fc   :  { %1654 = vpow2.f32 %v1364_v19 }
 0x4fd   :  { %1656 = vpow2.f32 %v1365_v20 }
 0x504   :  { %v1651_v21 = vpop.eup %1650 }
 0x505   :  { %v1653_v22 = vpop.eup %1652  ;;  %v1166_v23 = vadd.f32 1.0, %v1651_v21 }
 0x506   :  { %v1655_v24 = vpop.eup %1654  ;;  %v1167_v25 = vadd.f32 1.0, %v1653_v22 }
 0x507   :  { %v1657_v26 = vpop.eup %1656  ;;  %1658 = vrcp.f32 %v1166_v23  ;;  %v1172_v27 = vadd.f32 1.0, %v1655_v24 }
 0x508   :  { %1660 = vrcp.f32 %v1167_v25  ;;  %v1173_v28 = vadd.f32 1.0, %v1657_v26 }
 0x509   :  { %1662 = vrcp.f32 %v1172_v27 }
 0x50a   :  { %1664 = vrcp.f32 %v1173_v28 }
 0x511   :  { %v1659_v29 = vpop.eup %1658 }
 0x512   :  { %v1661_v30 = vpop.eup %1660 }
 0x513   :  { %v1663_v31 = vpop.eup %1662  ;;  %v1374_v32 = vpack.c.bf16 %v1661_v30, %v1659_v29 }
 0x514   :  { %v1665_v33 = vpop.eup %1664 }
 0x515   :  { %1236 = vst [vmem:[#allocation14 + $0x10] sm:$0xff] %v1374_v32  ;;  %v1377_v34 = vpack.c.bf16 %v1665_v33, %v1663_v31 }
 0x517   :  { %1239 = vst [vmem:[#allocation14 + $0x28] sm:$0xff] %v1377_v34 }
 0x518   :  { %1809 = shalt.err (!%p1806_p10)
}
 0x519   :  { %s1810_s22 = scalar_lea.hbm %s2080_s11, 768 }
 0x51a   :  { %p1811_p11 = scmp.ne.s32.totalorder %s2080_s11, %s1810_s22  ;;  %p1814_p12 = scmp.lt.u32.totalorder %s1810_s22, %s2080_s11 }
 0x51c   :  { %p1816_p13 = pnand %p1814_p12, %p1811_p11 }
 0x51e   :  { %1819 = shalt.err (!%p1816_p13)
}
 0x51f   :  { %1251 = dma.vmem_to_hbm [thread:$0]  %s1246_s20, 768, %s2080_s11, [#allocation5], %s1840_s7, %s1840_s7, %s1841_s27  }
 0x520   :  { %1828 = dma.done.wait [#allocation5], 768  }
 0x521   :  { %1829 = vsyncadd [#allocation5], 4294966528 }
 0x522   :  { %1255 = vsyncpa [#allocation4], 1 }
 0x523   :  { %1256 = vsyncpa [#allocation7], 1 }
 0x524   :  { %1257 = vsyncpa [#allocation10], 1 }
 0x525   :  { %1258 = vsyncpa [#allocation13], 1 }
 0x526   :  { %1259 = vsyncpa [#allocation5], 1 }

// kernel: tpu_custom_call.1
= control target key start
LH: loop header
LB: loop body
LE: loop exit
PB: predicated region body
PF: predicated region fallthrough
CT: control target
= control target key end

     0   :  { %16 = vsyncpa [#allocation4], 0  ;;  %s2069_s0 = inlined_call_operand.hbm [shape: bf16[16,256], index: 0, kind: input, shape index: {}]   ;;  %s2070_s1 = inlined_call_operand.hbm [shape: bf16[256,128], index: 1, kind: input, shape index: {}]   ;;  %s2071_s2 = inlined_call_operand.vmem [shape: f32[1,128], index: 2, kind: input, shape index: {}]   ;;  %s2072_s3 = inlined_call_operand.hbm [shape: bf16[128,128], index: 3, kind: input, shape index: {}]   ;;  %s2073_s4 = inlined_call_operand.vmem [shape: f32[1,128], index: 4, kind: input, shape index: {}]   ;;  %s2074_s5 = inlined_call_operand.hbm [shape: bf16[128,128], index: 5, kind: input, shape index: {}]   ;;  %s2075_s6 = inlined_call_operand.vmem [shape: f32[1,128], index: 6, kind: input, shape index: {}]   ;;  %s2076_s7 = inlined_call_operand.hbm [shape: bf16[128,128], index: 7, kind: input, shape index: {}]   ;;  %s2077_s8 = inlined_call_operand.vmem [shape: f32[1,128], index: 8, kind: input, shape index: {}]   ;;  %s2078_s9 = inlined_call_operand.hbm [shape: bf16[128,768], index: 9, kind: input, shape index: {}]   ;;  %s2079_s10 = inlined_call_operand.vmem [shape: f32[1,768], index: 10, kind: input, shape index: {}]   ;;  %s2080_s11 = inlined_call_operand.hbm [shape: bf16[16,768], index: 11, kind: output, shape index: {}]  }
   0x1   :  { %17 = vsyncpa [#allocation7], 0 }
   0x2   :  { %18 = vsyncpa [#allocation10], 0 }
   0x3   :  { %19 = vsyncpa [#allocation13], 0 }
   0x4   :  { %20 = vsyncpa [#allocation5], 0  ;;  %s1830_s17 = smov [#allocation6]   ;;  %s1666_s21 = scalar_lea.hbm %s2070_s1, 2048 }
   0x5   :  { %s38_s18 = sshll.u32 %s1830_s17, 4  ;;  %p1667_p0 = scmp.ne.s32.totalorder %s2070_s1, %s1666_s21  ;;  %s39_s18 = int_to_ptr.vmem [resolvable:$true] %s38_s18 }
   0x6   :  { %p1670_p1 = scmp.lt.u32.totalorder %s1666_s21, %s2070_s1 }
   0x8   :  { %p1672_p2 = pnand %p1670_p1, %p1667_p0 }
   0xa   :  { %1675 = shalt.err (!%p1672_p2)
}
   0xb   :  { %s1676_s26 = scalar_lea.vmem %s39_s18, 2048  ;;  %p1681_p4 = scmp.lt.s32.totalorder %s39_s18, %s39_s18 }
   0xc   :  { %p1677_p3 = scmp.ne.s32.totalorder %s39_s18, %s1676_s26  ;;  %p1682_p5 = scmp.lt.s32.totalorder %s1676_s26, %s1676_s26 }
   0xe   :  { %p1683_p6 = por %p1682_p5, %p1681_p4 }
  0x10   :  { %p1684_p7 = pnand %p1683_p6, %p1677_p3 }
  0x12   :  { %1687 = shalt.err (!%p1684_p7)
}
  0x13   :  { %s1831_s27 = smov 64   ;;  %s1832_s28 = smov 4  }
  0x14   :  { %44 = dma.hbm_to_vmem [thread:$0]  %s2070_s1, 2048, %s39_s18, [#allocation7], %s1831_s27, %s1831_s27, %s1832_s28  }
  0x15   :  { %s1833_s12 = smov [#allocation9]   ;;  %s1834_s14 = smov [#allocation3]  }
  0x16   :  { %s66_s13 = sshll.u32 %s1833_s12, 4  ;;  %s26_s15 = sshll.u32 %s1834_s14, 4  ;;  %s67_s13 = int_to_ptr.vmem [resolvable:$true] %s66_s13  ;;  %s27_s15 = int_to_ptr.vmem [resolvable:$true] %s26_s15 }
  0x17   :  { %s1688_s19 = scalar_lea.hbm %s2074_s5, 1024 }
  0x18   :  { %p1689_p8 = scmp.ne.s32.totalorder %s2074_s5, %s1688_s19  ;;  %p1692_p9 = scmp.lt.u32.totalorder %s1688_s19, %s2074_s5 }
  0x1a   :  { %p1694_p10 = pnand %p1692_p9, %p1689_p8 }
  0x1c   :  { %1697 = shalt.err (!%p1694_p10)
}
  0x1d   :  { %s1698_s1 = scalar_lea.vmem %s67_s13, 1024  ;;  %p1703_p12 = scmp.lt.s32.totalorder %s67_s13, %s67_s13 }
  0x1e   :  { %p1699_p11 = scmp.ne.s32.totalorder %s67_s13, %s1698_s1  ;;  %p1704_p13 = scmp.lt.s32.totalorder %s1698_s1, %s1698_s1 }
  0x20   :  { %p1705_p0 = por %p1704_p13, %p1703_p12 }
  0x22   :  { %p1706_p1 = pnand %p1705_p0, %p1699_p11 }
  0x24   :  { %1709 = shalt.err (!%p1706_p1)
}
  0x25   :  { %72 = dma.hbm_to_vmem [thread:$0]  %s2074_s5, 1024, %s67_s13, [#allocation10], %s1831_s27, %s1831_s27, %s1832_s28  }
  0x26   :  { %s1710_s29 = scalar_lea.hbm %s2069_s0, 256 }
  0x27   :  { %p1711_p2 = scmp.ne.s32.totalorder %s2069_s0, %s1710_s29  ;;  %p1714_p3 = scmp.lt.u32.totalorder %s1710_s29, %s2069_s0 }
  0x29   :  { %p1716_p4 = pnand %p1714_p3, %p1711_p2 }
  0x2b   :  { %1719 = shalt.err (!%p1716_p4)
}
  0x2c   :  { %s1720_s17 = scalar_lea.vmem %s27_s15, 256  ;;  %p1725_p6 = scmp.lt.s32.totalorder %s27_s15, %s27_s15 }
  0x2d   :  { %p1721_p5 = scmp.ne.s32.totalorder %s27_s15, %s1720_s17  ;;  %p1726_p7 = scmp.lt.s32.totalorder %s1720_s17, %s1720_s17 }
  0x2f   :  { %p1727_p8 = por %p1726_p7, %p1725_p6 }
  0x31   :  { %p1728_p9 = pnand %p1727_p8, %p1721_p5 }
  0x33   :  { %1731 = shalt.err (!%p1728_p9)
}
  0x34   :  { %s1835_s5 = smov 128   ;;  %s1836_s13 = smov 8  }
  0x35   :  { %32 = dma.hbm_to_vmem [thread:$0]  %s2069_s0, 256, %s27_s15, [#allocation4], %s1835_s5, %s1835_s5, %s1836_s13  }
  0x36   :  { %s1837_s21 = smov [#allocation8]   ;;  %s1838_s23 = smov [#allocation11]  }
  0x37   :  { %s52_s22 = sshll.u32 %s1837_s21, 4  ;;  %s80_s1 = sshll.u32 %s1838_s23, 4  ;;  %s53_s22 = int_to_ptr.vmem [resolvable:$true] %s52_s22  ;;  %s81_s1 = int_to_ptr.vmem [resolvable:$true] %s80_s1 }
  0x38   :  { %s1732_s25 = scalar_lea.hbm %s2072_s3, 1024 }
  0x39   :  { %p1733_p10 = scmp.ne.s32.totalorder %s2072_s3, %s1732_s25  ;;  %p1736_p11 = scmp.lt.u32.totalorder %s1732_s25, %s2072_s3 }
  0x3b   :  { %p1738_p12 = pnand %p1736_p11, %p1733_p10 }
  0x3d   :  { %1741 = shalt.err (!%p1738_p12)
}
  0x3e   :  { %s1742_s0 = scalar_lea.vmem %s53_s22, 1024  ;;  %p1747_p0 = scmp.lt.s32.totalorder %s53_s22, %s53_s22 }
  0x3f   :  { %p1743_p13 = scmp.ne.s32.totalorder %s53_s22, %s1742_s0  ;;  %p1748_p1 = scmp.lt.s32.totalorder %s1742_s0, %s1742_s0 }
  0x41   :  { %p1749_p2 = por %p1748_p1, %p1747_p0 }
  0x43   :  { %p1750_p3 = pnand %p1749_p2, %p1743_p13 }
  0x45   :  { %1753 = shalt.err (!%p1750_p3)
}
  0x46   :  { %58 = dma.hbm_to_vmem [thread:$0]  %s2072_s3, 1024, %s53_s22, [#allocation7], %s1831_s27, %s1831_s27, %s1832_s28  }
  0x47   :  { %s1754_s5 = scalar_lea.hbm %s2076_s7, 1024 }
  0x48   :  { %p1755_p4 = scmp.ne.s32.totalorder %s2076_s7, %s1754_s5  ;;  %p1758_p5 = scmp.lt.u32.totalorder %s1754_s5, %s2076_s7 }
  0x4a   :  { %p1760_p6 = pnand %p1758_p5, %p1755_p4 }
  0x4c   :  { %1763 = shalt.err (!%p1760_p6)
}
  0x4d   :  { %s1764_s23 = scalar_lea.vmem %s81_s1, 1024  ;;  %p1769_p8 = scmp.lt.s32.totalorder %s81_s1, %s81_s1 }
  0x4e   :  { %p1765_p7 = scmp.ne.s32.totalorder %s81_s1, %s1764_s23  ;;  %p1770_p9 = scmp.lt.s32.totalorder %s1764_s23, %s1764_s23 }
  0x50   :  { %p1771_p10 = por %p1770_p9, %p1769_p8 }
  0x52   :  { %p1772_p11 = pnand %p1771_p10, %p1765_p7 }
  0x54   :  { %1775 = shalt.err (!%p1772_p11)
}
  0x55   :  { %86 = dma.hbm_to_vmem [thread:$0]  %s2076_s7, 1024, %s81_s1, [#allocation10], %s1831_s27, %s1831_s27, %s1832_s28  }
  0x56   :  { %s1839_s18 = smov [#allocation12]   ;;  %s1776_s29 = scalar_lea.hbm %s2078_s9, 6144 }
  0x57   :  { %s94_s24 = sshll.u32 %s1839_s18, 4  ;;  %p1777_p12 = scmp.ne.s32.totalorder %s2078_s9, %s1776_s29  ;;  %s95_s24 = int_to_ptr.vmem [resolvable:$true] %s94_s24 }
  0x58   :  { %p1780_p13 = scmp.lt.u32.totalorder %s1776_s29, %s2078_s9 }
  0x5a   :  { %p1782_p0 = pnand %p1780_p13, %p1777_p12 }
  0x5c   :  { %1785 = shalt.err (!%p1782_p0)
}
  0x5d   :  { %s1786_s14 = scalar_lea.vmem %s95_s24, 6144  ;;  %p1791_p2 = scmp.lt.s32.totalorder %s95_s24, %s95_s24 }
  0x5e   :  { %p1787_p1 = scmp.ne.s32.totalorder %s95_s24, %s1786_s14  ;;  %p1792_p3 = scmp.lt.s32.totalorder %s1786_s14, %s1786_s14 }
  0x60   :  { %p1793_p4 = por %p1792_p3, %p1791_p2 }
  0x62   :  { %p1794_p5 = pnand %p1793_p4, %p1787_p1 }
  0x64   :  { %1797 = shalt.err (!%p1794_p5)
}
  0x65   :  { %s1840_s7 = smov 384   ;;  %s1841_s27 = smov 24  }
  0x66   :  { %100 = dma.hbm_to_vmem [thread:$0]  %s2078_s9, 6144, %s95_s24, [#allocation13], %s1840_s7, %s1840_s7, %s1841_s27  }
  0x67   :  { %1820 = dma.done.wait [#allocation4], 256  }
  0x68   :  { %1821 = vsyncadd [#allocation4], 4294967040 }
  0x69   :  { %1822 = dma.done.wait [#allocation7], 3072  }
  0x6a   :  { %1823 = vsyncadd [#allocation7], 4294964224 }
  0x6b   :  { %1824 = dma.done.wait [#allocation10], 2048  }
  0x6c   :  { %1825 = vsyncadd [#allocation10], 4294965248 }
  0x6d   :  { %1826 = dma.done.wait [#allocation13], 6144  }
  0x6e   :  { %1827 = vsyncadd [#allocation13], 4294961152  ;;  %v1842_v0 = vmov 0.0   ;;  %v1503_v1 = vld [vmem:[#allocation6 + $0x40] sm:$0xff]   ;;  %v1505_v3 = vld [vmem:[#allocation6 + $0x48] sm:$0xff]   ;;  %vm1843_vm0 = vmmov 0  }
  0x6f   :  { %1427 = vmatprep.subr.bf16.mxu1 %v1842_v0  ;;  %v1504_v2 = vld [vmem:[#allocation6] sm:$0xff]   ;;  %1378 = vmatprep.subr.bf16.mxu0 %v1503_v1  ;;  %v1506_v4 = vld [vmem:[#allocation6 + $0x8] sm:$0xff]   ;;  %v1507_v5 = vld [vmem:[#allocation6 + $0x50] sm:$0xff]  }
  0x70   :  { %1379 = vmatpush3.bf16.msra.mxu0 %v1504_v2  ;;  %v1508_v6 = vld [vmem:[#allocation6 + $0x10] sm:$0xff]   ;;  %v1509_v7 = vld [vmem:[#allocation6 + $0x58] sm:$0xff]   ;;  %v1511_v9 = vld [vmem:[#allocation6 + $0x60] sm:$0xff]   ;;  %1443 = vmatprep.mubr.msk.bf16.mxu1 %vm1843_vm0, %v1842_v0 }
  0x71   :  { %1380 = vmatprep.subr.bf16.mxu0 %v1505_v3  ;;  %v1510_v8 = vld [vmem:[#allocation6 + $0x18] sm:$0xff]   ;;  %v1512_v10 = vld [vmem:[#allocation6 + $0x20] sm:$0xff]   ;;  %v1513_v11 = vld [vmem:[#allocation6 + $0x68] sm:$0xff]  }
  0x72   :  { %v1514_v12 = vld [vmem:[#allocation6 + $0x28] sm:$0xff]   ;;  %v1521_v13 = vld [vmem:[#allocation3 + $0x4] ss:$8 sps:$4 sm:$0xff]   ;;  %v1522_v14 = vld [vmem:[#allocation8] sm:$0xff]  }
  0x73   :  { %v1515_v15 = vld [vmem:[#allocation6 + $0x70] sm:$0xff]   ;;  %302 = vmatprep.mubr.bf16.mxu0 %v1521_v13  ;;  %1428 = vmatpush3.bf16.msra.mxu1 %v1522_v14  ;;  %v1523_v16 = vld [vmem:[#allocation8 + $0x8] sm:$0xff]   ;;  %v1517_v18 = vld [vmem:[#allocation6 + $0x78] sm:$0xff]  }
  0x74   :  { %1381 = vmatpush3.bf16.msra.mxu0 %v1506_v4  ;;  %v1516_v17 = vld [vmem:[#allocation6 + $0x30] sm:$0xff]   ;;  %1429 = vmatprep.subr.bf16.mxu1 %v1842_v0  ;;  %v1518_v20 = vld [vmem:[#allocation6 + $0x38] sm:$0xff]   ;;  %v1526_v23 = vld [vmem:[#allocation8 + $0x20] sm:$0xff]  }
  0x75   :  { %1382 = vmatprep.subr.bf16.mxu0 %v1507_v5  ;;  %v1524_v19 = vld [vmem:[#allocation8 + $0x10] sm:$0xff]   ;;  %v1525_v21 = vld [vmem:[#allocation8 + $0x18] sm:$0xff]   ;;  %v1527_v24 = vld [vmem:[#allocation8 + $0x28] sm:$0xff]  }
  0x76   :  { %v1519_v22 = vld [vmem:[#allocation3] ss:$8 sps:$4 sm:$0xff]   ;;  %v1530_v27 = vld [vmem:[#allocation9] sm:$0xff]   ;;  %v1531_v28 = vld [vmem:[#allocation9 + $0x8] sm:$0xff]  }
  0x77   :  { %1430 = vmatpush3.bf16.msra.mxu1 %v1523_v16  ;;  %v1528_v25 = vld [vmem:[#allocation8 + $0x30] sm:$0xff]   ;;  %v1529_v26 = vld [vmem:[#allocation8 + $0x38] sm:$0xff]   ;;  %v1534_v31 = vld [vmem:[#allocation9 + $0x20] sm:$0xff]  }
  0x78   :  { %1383 = vmatpush3.bf16.msra.mxu0 %v1508_v6  ;;  %1431 = vmatprep.subr.bf16.mxu1 %v1842_v0  ;;  %v1532_v29 = vld [vmem:[#allocation9 + $0x10] sm:$0xff]   ;;  %v1533_v30 = vld [vmem:[#allocation9 + $0x18] sm:$0xff]   ;;  %v1535_v32 = vld [vmem:[#allocation9 + $0x28] sm:$0xff]  }
  0x79   :  { %1384 = vmatprep.subr.bf16.mxu0 %v1509_v7  ;;  %v1278_v35 = vld [vmem:[%s2071_s2] ss:$0 sm:$0xff]  ;;  %v1537_v46 = vld [vmem:[#allocation9 + $0x38] sm:$0xff]   ;;  %v1538_v47 = vld [vmem:[#allocation11] sm:$0xff]  }
  0x7a   :  { %v1536_v45 = vld [vmem:[#allocation9 + $0x30] sm:$0xff]   ;;  %v1539_v48 = vld [vmem:[#allocation11 + $0x8] sm:$0xff]   ;;  %v1541_v50 = vld [vmem:[#allocation11 + $0x18] sm:$0xff]  }
  0x7b   :  { %1432 = vmatpush3.bf16.msra.mxu1 %v1524_v19  ;;  %v1540_v49 = vld [vmem:[#allocation11 + $0x10] sm:$0xff]   ;;  %v1542_v51 = vld [vmem:[#allocation11 + $0x20] sm:$0xff]   ;;  %v1543_v52 = vld [vmem:[#allocation11 + $0x28] sm:$0xff]  }
  0x7c   :  { %1385 = vmatpush3.bf16.msra.mxu0 %v1510_v8  ;;  %1433 = vmatprep.subr.bf16.mxu1 %v1842_v0  ;;  %v1279_v53 = vld [vmem:[%s2073_s4] ss:$0 sm:$0xff]  ;;  %v1545_v1 = vld [vmem:[#allocation11 + $0x38] sm:$0xff]   ;;  %v1551_v4 = vld [vmem:[#allocation12 + $0xc] ss:$24 sps:$4 sm:$0xff]  }
  0x7d   :  { %1386 = vmatprep.subr.bf16.mxu0 %v1511_v9  ;;  %v1544_v63 = vld [vmem:[#allocation11 + $0x30] sm:$0xff]   ;;  %v1546_v2 = vld [vmem:[#allocation12] ss:$24 sps:$4 sm:$0xff]   ;;  %v1548_v3 = vld [vmem:[#allocation12 + $0x4] ss:$24 sps:$4 sm:$0xff]  }
  0x7e   :  { %v1554_v5 = vld [vmem:[#allocation12 + $0x34] ss:$24 sps:$4 sm:$0xff]   ;;  %v1552_v6 = vld [vmem:[#allocation12 + $0x30] ss:$24 sps:$4 sm:$0xff]   ;;  %v1560_v7 = vld [vmem:[#allocation12 + $0x64] ss:$24 sps:$4 sm:$0xff]  }
  0x7f   :  { %1434 = vmatpush3.bf16.msra.mxu1 %v1525_v21  ;;  %v1558_v8 = vld [vmem:[#allocation12 + $0x60] ss:$24 sps:$4 sm:$0xff]   ;;  %v1566_v9 = vld [vmem:[#allocation12 + $0x94] ss:$24 sps:$4 sm:$0xff]   ;;  %v1576_v13 = vld [vmem:[#allocation12 + $0xf0] ss:$24 sps:$4 sm:$0xff]  }
  0x80   :  { %1387 = vmatpush3.bf16.msra.mxu0 %v1512_v10  ;;  %1435 = vmatprep.subr.bf16.mxu1 %v1842_v0  ;;  %v1564_v10 = vld [vmem:[#allocation12 + $0x90] ss:$24 sps:$4 sm:$0xff]  }
  0x81   :  { %1388 = vmatprep.subr.bf16.mxu0 %v1513_v11  ;;  %v1570_v11 = vld [vmem:[#allocation12 + $0xc0] ss:$24 sps:$4 sm:$0xff]   ;;  %v1288_v14 = vld [vmem:[%s2075_s6] ss:$0 sm:$0xff] }
  0x83   :  { %1436 = vmatpush3.bf16.msra.mxu1 %v1526_v23  ;;  %v1549_v23 = vld [vmem:[#allocation12 + $0x8] ss:$24 sps:$4 sm:$0xff]  }
  0x84   :  { %1389 = vmatpush3.bf16.msra.mxu0 %v1514_v12  ;;  %1437 = vmatprep.subr.bf16.mxu1 %v1842_v0  ;;  %v1578_v12 = vld [vmem:[#allocation12 + $0xf4] ss:$24 sps:$4 sm:$0xff]  }
  0x85   :  { %1390 = vmatprep.subr.bf16.mxu0 %v1515_v15 }
  0x87   :  { %1438 = vmatpush3.bf16.msra.mxu1 %v1527_v24 }
  0x88   :  { %1391 = vmatpush3.bf16.msra.mxu0 %v1516_v17  ;;  %1439 = vmatprep.subr.bf16.mxu1 %v1842_v0 }
  0x89   :  { %1392 = vmatprep.subr.bf16.mxu0 %v1517_v18 }
  0x8b   :  { %1440 = vmatpush3.bf16.msra.mxu1 %v1528_v25  ;;  %v1557_v25 = vld [vmem:[#allocation12 + $0x3c] ss:$24 sps:$4 sm:$0xff]  }
  0x8c   :  { %1393 = vmatpush3.bf16.msra.mxu0 %v1518_v20  ;;  %1441 = vmatprep.subr.bf16.mxu1 %v1842_v0 }
  0x8d   :  { %1447 = vmatprep.subr.bf16.mxu0 %v1842_v0 }
  0x8f   :  { %303 = vmatmul.mubr.bf16.vlgmr.msra.gmra.mrb[0].mxu0 %v1519_v22  ;;  %1442 = vmatpush3.bf16.msra.mxu1 %v1529_v26  ;;  %v1555_v26 = vld [vmem:[#allocation12 + $0x38] ss:$24 sps:$4 sm:$0xff]  }
  0x90   :  { %1463 = vmatprep.mubr.msk.bf16.mxu0 %vm1843_vm0, %v1842_v0  ;;  %1467 = vmatprep.subr.bf16.mxu1 %v1842_v0 }
  0x91   :  { %1448 = vmatpush3.bf16.msra.mxu0 %v1530_v27  ;;  %v1563_v27 = vld [vmem:[#allocation12 + $0x6c] ss:$24 sps:$4 sm:$0xff]  }
  0x92   :  { %1449 = vmatprep.subr.bf16.mxu0 %v1842_v0 }
  0x95   :  { %1450 = vmatpush3.bf16.msra.mxu0 %v1531_v28  ;;  %v1561_v28 = vld [vmem:[#allocation12 + $0x68] ss:$24 sps:$4 sm:$0xff]  }
  0x96   :  { %1451 = vmatprep.subr.bf16.mxu0 %v1842_v0 }
  0x99   :  { %1452 = vmatpush3.bf16.msra.mxu0 %v1532_v29  ;;  %v1569_v29 = vld [vmem:[#allocation12 + $0x9c] ss:$24 sps:$4 sm:$0xff]  }
  0x9a   :  { %1453 = vmatprep.subr.bf16.mxu0 %v1842_v0 }
  0x9d   :  { %1454 = vmatpush3.bf16.msra.mxu0 %v1533_v30  ;;  %v1567_v30 = vld [vmem:[#allocation12 + $0x98] ss:$24 sps:$4 sm:$0xff]  }
  0x9e   :  { %1455 = vmatprep.subr.bf16.mxu0 %v1842_v0 }
  0xa1   :  { %1456 = vmatpush3.bf16.msra.mxu0 %v1534_v31  ;;  %v1575_v31 = vld [vmem:[#allocation12 + $0xcc] ss:$24 sps:$4 sm:$0xff]  }
  0xa2   :  { %1457 = vmatprep.subr.bf16.mxu0 %v1842_v0 }
  0xa5   :  { %1458 = vmatpush3.bf16.msra.mxu0 %v1535_v32  ;;  %v1573_v32 = vld [vmem:[#allocation12 + $0xc8] ss:$24 sps:$4 sm:$0xff]  }
  0xa6   :  { %1459 = vmatprep.subr.bf16.mxu0 %v1842_v0 }
  0xa9   :  { %1460 = vmatpush3.bf16.msra.mxu0 %v1536_v45  ;;  %v1297_v45 = vld [vmem:[%s2077_s8] ss:$0 sm:$0xff] }
  0xaa   :  { %1461 = vmatprep.subr.bf16.mxu0 %v1842_v0 }
  0xad   :  { %1462 = vmatpush3.bf16.msra.mxu0 %v1537_v46 }
  0xae   :  { %997 = vmatprep.subr.bf16.mxu0 %v1548_v3  ;;  %v1614_v3 = vld [vmem:[#allocation12 + $0x134] ss:$24 sps:$4 sm:$0xff]  }
 0x162   :  { %v1394_v33 = vpop.f32.mrb[0].mxu0 }
 0x163   :  { %v1395_v34 = vpop.f32.mrb[1].mxu0 }
 0x164   :  { %v1396_v36 = vadd.f32 %v1395_v34, %v1394_v33  ;;  %v1397_v37 = vpop.f32.mrb[2].mxu0  ;;  %v1581_v33 = vld [vmem:[#allocation12 + $0xfc] ss:$24 sps:$4 sm:$0xff]   ;;  %v1579_v34 = vld [vmem:[#allocation12 + $0xf8] ss:$24 sps:$4 sm:$0xff]  }
 0x165   :  { %v1398_v38 = vpop.f32.mrb[3].mxu0 }
 0x166   :  { %v327_v39 = vadd.f32 %v1396_v36, %v1278_v35  ;;  %v1399_v40 = vadd.f32 %v1398_v38, %v1397_v37  ;;  %v1582_v36 = vld [vmem:[#allocation12 + $0x120] ss:$24 sps:$4 sm:$0xff]   ;;  %v1587_v37 = vld [vmem:[#allocation12 + $0x12c] ss:$24 sps:$4 sm:$0xff]  }
 0x167   :  { %v1585_v38 = vld [vmem:[#allocation12 + $0x128] ss:$24 sps:$4 sm:$0xff]  }
 0x168   :  { %v328_v41 = vadd.f32 %v1399_v40, %v1278_v35  ;;  %v329_v42 = vmax.f32 %v327_v39, 0.0  ;;  %v1584_v35 = vld [vmem:[#allocation12 + $0x124] ss:$24 sps:$4 sm:$0xff]   ;;  %v1590_v39 = vld [vmem:[#allocation12 + $0x154] ss:$24 sps:$4 sm:$0xff]  }
 0x169   :  { %v1588_v40 = vld [vmem:[#allocation12 + $0x150] ss:$24 sps:$4 sm:$0xff]  }
 0x16a   :  { %v330_v43 = vmax.f32 %v328_v41, 0.0  ;;  %v1593_v41 = vld [vmem:[#allocation12 + $0x15c] ss:$24 sps:$4 sm:$0xff]  }
 0x16c   :  { %v331_v44 = vpack.c.bf16 %v330_v43, %v329_v42  ;;  %v1591_v42 = vld [vmem:[#allocation12 + $0x158] ss:$24 sps:$4 sm:$0xff]   ;;  %v1596_v43 = vld [vmem:[#allocation12 + $0x14] ss:$24 sps:$4 sm:$0xff]  }
 0x16e   :  { %1444 = vmatmul.mubr.bf16.vlgmr.msra.gmra.mrb[0].mxu1 %v331_v44  ;;  %v1844_v44 = vmov 0  }
 0x16f   :  { %1483 = vmatprep.mubr.msk.bf16.mxu1 %vm1843_vm0, %v1842_v0  ;;  %1468 = vmatpush3.bf16.msra.mxu1 %v1538_v47 }
 0x170   :  { %1469 = vmatprep.subr.bf16.mxu1 %v1842_v0 }
 0x173   :  { %1470 = vmatpush3.bf16.msra.mxu1 %v1539_v48 }
 0x174   :  { %1471 = vmatprep.subr.bf16.mxu1 %v1842_v0 }
 0x177   :  { %1472 = vmatpush3.bf16.msra.mxu1 %v1540_v49 }
 0x178   :  { %1473 = vmatprep.subr.bf16.mxu1 %v1842_v0 }
 0x17b   :  { %1474 = vmatpush3.bf16.msra.mxu1 %v1541_v50 }
 0x17c   :  { %1475 = vmatprep.subr.bf16.mxu1 %v1842_v0 }
 0x17f   :  { %1476 = vmatpush3.bf16.msra.mxu1 %v1542_v51 }
 0x180   :  { %1477 = vmatprep.subr.bf16.mxu1 %v1842_v0 }
 0x183   :  { %1478 = vmatpush3.bf16.msra.mxu1 %v1543_v52 }
 0x184   :  { %1479 = vmatprep.subr.bf16.mxu1 %v1842_v0 }
 0x187   :  { %1480 = vmatpush3.bf16.msra.mxu1 %v1544_v63  ;;  %v1606_v63 = vld [vmem:[#allocation12 + $0xd0] ss:$24 sps:$4 sm:$0xff]  }
 0x188   :  { %1481 = vmatprep.subr.bf16.mxu1 %v1842_v0  ;;  %v1572_v0 = vld [vmem:[#allocation12 + $0xc4] ss:$24 sps:$4 sm:$0xff]  }
 0x18b   :  { %1482 = vmatpush3.bf16.msra.mxu1 %v1545_v1  ;;  %v1611_v1 = vld [vmem:[#allocation12 + $0x104] ss:$24 sps:$4 sm:$0xff]  }
 0x18c   :  { %1040 = vmatprep.subr.bf16.mxu1 %v1551_v4  ;;  %v1612_v4 = vld [vmem:[#allocation12 + $0x130] ss:$24 sps:$4 sm:$0xff]  }
 0x241   :  { %v437_v54 = vpop.f32.mrb[0].mxu1 }
 0x242   :  { %v438_v55 = vadd.f32 %v1279_v53, %v437_v54  ;;  %v1445_v56 = vpop.f32.mrb[1].mxu1  ;;  %v1594_v54 = vld [vmem:[#allocation12 + $0x10] ss:$24 sps:$4 sm:$0xff]  }
 0x243   :  { %v440_v57 = vpop.f32.mrb[2].mxu1  ;;  %v1599_v56 = vld [vmem:[#allocation12 + $0x44] ss:$24 sps:$4 sm:$0xff]  }
 0x244   :  { %v441_v58 = vadd.f32 %v1279_v53, %v440_v57  ;;  %v1446_v59 = vpop.f32.mrb[3].mxu1  ;;  %v444_v60 = vmax.f32 %v438_v55, 0.0  ;;  %v1597_v57 = vld [vmem:[#allocation12 + $0x40] ss:$24 sps:$4 sm:$0xff]  }
 0x245   :  { %v1600_v59 = vld [vmem:[#allocation12 + $0x70] ss:$24 sps:$4 sm:$0xff]  }
 0x246   :  { %v445_v61 = vmax.f32 %v441_v58, 0.0  ;;  %v1602_v58 = vld [vmem:[#allocation12 + $0x74] ss:$24 sps:$4 sm:$0xff]  }
 0x248   :  { %v446_v62 = vpack.c.bf16 %v445_v61, %v444_v60  ;;  %v1605_v60 = vld [vmem:[#allocation12 + $0xa4] ss:$24 sps:$4 sm:$0xff]   ;;  %v1603_v61 = vld [vmem:[#allocation12 + $0xa0] ss:$24 sps:$4 sm:$0xff]  }
 0x24a   :  { %1464 = vmatmul.mubr.bf16.vlgmr.msra.gmra.mrb[4].mxu0 %v446_v62  ;;  %v1608_v62 = vld [vmem:[#allocation12 + $0xd4] ss:$24 sps:$4 sm:$0xff]  }
 0x24b   :  { %998 = vmatpush1.bf16.msra.mxu0 %v1546_v2  ;;  %1029 = vmatprep.mubr.bf16.mxu0 %v1844_v44  ;;  %v1609_v2 = vld [vmem:[#allocation12 + $0x100] ss:$24 sps:$4 sm:$0xff]  }
 0x24c   :  { %999 = vmatprep.subr.bf16.mxu0 %v1554_v5  ;;  %v1617_v5 = vld [vmem:[#allocation12 + $0x164] ss:$24 sps:$4 sm:$0xff]  }
 0x24f   :  { %1000 = vmatpush1.bf16.msra.mxu0 %v1552_v6  ;;  %v1615_v6 = vld [vmem:[#allocation12 + $0x160] ss:$24 sps:$4 sm:$0xff]  }
 0x250   :  { %1001 = vmatprep.subr.bf16.mxu0 %v1560_v7  ;;  %v727_v7 = vlaneseq }
 0x253   :  { %1002 = vmatpush1.bf16.msra.mxu0 %v1558_v8  ;;  %v2035_v8 = vshrl.u32 %v727_v7, 7 }
 0x254   :  { %1003 = vmatprep.subr.bf16.mxu0 %v1566_v9 }
 0x255   :  { %v729_v9 = vsub.s32 0, %v2035_v8 }
 0x257   :  { %1004 = vmatpush1.bf16.msra.mxu0 %v1564_v10  ;;  %v737_v10 = vsub.s32 2, %v2035_v8 }
 0x258   :  { %1005 = vmatprep.subr.bf16.mxu0 %v1572_v0  ;;  %v2042_v0 = vld [vmem:[%s2079_s10] sm:$0x3f]  ;;  %s1845_s10 = smov [#allocation14]  }
 0x259   :  { %s1245_s20 = sshll.u32 %s1845_s10, 4  ;;  %s1246_s20 = int_to_ptr.vmem [resolvable:$true] %s1245_s20 }
 0x25a   :  { %s1798_s21 = scalar_lea.vmem %s1246_s20, 768  ;;  %p1803_p7 = scmp.lt.s32.totalorder %s1246_s20, %s1246_s20 }
 0x25b   :  { %1006 = vmatpush1.bf16.msra.mxu0 %v1570_v11  ;;  %v733_v11 = vsub.s32 1, %v2035_v8  ;;  %p1799_p6 = scmp.ne.s32.totalorder %s1246_s20, %s1798_s21  ;;  %p1804_p8 = scmp.lt.s32.totalorder %s1798_s21, %s1798_s21 }
 0x25c   :  { %1007 = vmatprep.subr.bf16.mxu0 %v1578_v12  ;;  %v741_v12 = vsub.s32 3, %v2035_v8 }
 0x25d   :  { %p1805_p9 = por %p1804_p8, %p1803_p7 }
 0x25f   :  { %1008 = vmatpush1.bf16.msra.mxu0 %v1576_v13  ;;  %v730_v13 = vrot.slane %v2042_v0, %v729_v9  ;;  %p1806_p10 = pnand %p1805_p9, %p1799_p6 }
 0x260   :  { %1009 = vmatprep.subr.bf16.mxu0 %v1584_v35 }
 0x263   :  { %1010 = vmatpush1.bf16.msra.mxu0 %v1582_v36 }
 0x264   :  { %1011 = vmatprep.subr.bf16.mxu0 %v1590_v39 }
 0x267   :  { %1012 = vmatpush1.bf16.msra.mxu0 %v1588_v40 }
 0x268   :  { %1083 = vmatprep.subr.bf16.mxu0 %v1596_v43 }
 0x31d   :  { %v552_v15 = vpop.f32.mrb[4].mxu0 }
 0x31e   :  { %v553_v16 = vadd.f32 %v1288_v14, %v552_v15  ;;  %v1465_v17 = vpop.f32.mrb[5].mxu0  ;;  %v734_v15 = vrot.slane %v2042_v0, %v733_v11 }
 0x31f   :  { %v555_v18 = vpop.f32.mrb[6].mxu0 }
 0x320   :  { %v556_v19 = vadd.f32 %v1288_v14, %v555_v18  ;;  %v1466_v20 = vpop.f32.mrb[7].mxu0  ;;  %v559_v21 = vmax.f32 %v553_v16, 0.0  ;;  %v738_v14 = vrot.slane %v2042_v0, %v737_v10  ;;  %v742_v16 = vrot.slane %v2042_v0, %v741_v12 }
 0x322   :  { %v560_v22 = vmax.f32 %v556_v19, 0.0 }
 0x324   :  { %v561_v24 = vpack.c.bf16 %v560_v22, %v559_v21 }
 0x326   :  { %1484 = vmatmul.mubr.bf16.vlgmr.msra.gmra.mrb[4].mxu1 %v561_v24 }
 0x327   :  { %1041 = vmatpush1.bf16.msra.mxu1 %v1549_v23  ;;  %1072 = vmatprep.mubr.bf16.mxu1 %v1844_v44 }
 0x328   :  { %1042 = vmatprep.subr.bf16.mxu1 %v1557_v25 }
 0x32b   :  { %1043 = vmatpush1.bf16.msra.mxu1 %v1555_v26 }
 0x32c   :  { %1044 = vmatprep.subr.bf16.mxu1 %v1563_v27 }
 0x32f   :  { %1045 = vmatpush1.bf16.msra.mxu1 %v1561_v28 }
 0x330   :  { %1046 = vmatprep.subr.bf16.mxu1 %v1569_v29 }
 0x333   :  { %1047 = vmatpush1.bf16.msra.mxu1 %v1567_v30 }
 0x334   :  { %1048 = vmatprep.subr.bf16.mxu1 %v1575_v31 }
 0x337   :  { %1049 = vmatpush1.bf16.msra.mxu1 %v1573_v32 }
 0x338   :  { %1050 = vmatprep.subr.bf16.mxu1 %v1581_v33 }
 0x33b   :  { %1051 = vmatpush1.bf16.msra.mxu1 %v1579_v34 }
 0x33c   :  { %1052 = vmatprep.subr.bf16.mxu1 %v1587_v37 }
 0x33f   :  { %1053 = vmatpush1.bf16.msra.mxu1 %v1585_v38 }
 0x340   :  { %1054 = vmatprep.subr.bf16.mxu1 %v1593_v41 }
 0x343   :  { %1055 = vmatpush1.bf16.msra.mxu1 %v1591_v42 }
 0x3f9   :  { %v667_v46 = vpop.f32.mrb[4].mxu1 }
 0x3fa   :  { %v668_v47 = vadd.f32 %v1297_v45, %v667_v46  ;;  %v1485_v48 = vpop.f32.mrb[5].mxu1 }
 0x3fb   :  { %v670_v49 = vpop.f32.mrb[6].mxu1 }
 0x3fc   :  { %v671_v50 = vadd.f32 %v1297_v45, %v670_v49  ;;  %v1486_v51 = vpop.f32.mrb[7].mxu1  ;;  %v674_v52 = vmax.f32 %v668_v47, 0.0 }
 0x3fe   :  { %v675_v53 = vmax.f32 %v671_v50, 0.0 }
 0x400   :  { %v676_v55 = vpack.c.bf16 %v675_v53, %v674_v52 }
 0x402   :  { %1030 = vmatmul.mubr.bf16.vlgmr.msra.gmra.mrb[8].mxu0 %v676_v55  ;;  %1073 = vmatmul.mubr.bf16.vlgmr.msra.gmra.mrb[8].mxu1 %v676_v55 }
 0x403   :  { %1084 = vmatpush1.bf16.msra.mxu0 %v1594_v54  ;;  %1115 = vmatprep.mubr.bf16.mxu0 %v1844_v44 }
 0x404   :  { %1085 = vmatprep.subr.bf16.mxu0 %v1599_v56 }
 0x407   :  { %1086 = vmatpush1.bf16.msra.mxu0 %v1597_v57  ;;  %v745_v57 = vsub.s32 4, %v2035_v8 }
 0x408   :  { %1087 = vmatprep.subr.bf16.mxu0 %v1602_v58  ;;  %v749_v58 = vsub.s32 5, %v2035_v8 }
 0x40b   :  { %1088 = vmatpush1.bf16.msra.mxu0 %v1600_v59 }
 0x40c   :  { %1089 = vmatprep.subr.bf16.mxu0 %v1605_v60 }
 0x40f   :  { %1090 = vmatpush1.bf16.msra.mxu0 %v1603_v61  ;;  %v746_v61 = vrot.slane %v2042_v0, %v745_v57 }
 0x410   :  { %1091 = vmatprep.subr.bf16.mxu0 %v1608_v62 }
 0x413   :  { %1092 = vmatpush1.bf16.msra.mxu0 %v1606_v63  ;;  %v750_v63 = vrot.slane %v2042_v0, %v749_v58 }
 0x414   :  { %1093 = vmatprep.subr.bf16.mxu0 %v1611_v1 }
 0x417   :  { %1094 = vmatpush1.bf16.msra.mxu0 %v1609_v2 }
 0x418   :  { %1095 = vmatprep.subr.bf16.mxu0 %v1614_v3 }
 0x41b   :  { %1096 = vmatpush1.bf16.msra.mxu0 %v1612_v4 }
 0x41c   :  { %1097 = vmatprep.subr.bf16.mxu0 %v1617_v5 }
 0x41f   :  { %1098 = vmatpush1.bf16.msra.mxu0 %v1615_v6 }
 0x422   :  { %1116 = vmatmul.mubr.bf16.vlgmr.msra.gmra.mrb[12].mxu0 %v676_v55 }
 0x4d5   :  { %v1031_v17 = vpop.f32.mrb[8].mxu0  ;;  %v1074_v18 = vpop.f32.mrb[8].mxu1 }
 0x4d6   :  { %v1032_v19 = vadd.f32 %v1031_v17, %v730_v13  ;;  %v1075_v20 = vadd.f32 %v1074_v18, %v738_v14  ;;  %v1033_v21 = vpop.f32.mrb[9].mxu0  ;;  %v1076_v22 = vpop.f32.mrb[9].mxu1 }
 0x4d7   :  { %v1034_v23 = vadd.f32 %v1033_v21, %v734_v15  ;;  %v1077_v24 = vadd.f32 %v1076_v22, %v742_v16  ;;  %v1035_v25 = vpop.f32.mrb[10].mxu0  ;;  %v1078_v26 = vpop.f32.mrb[10].mxu1 }
 0x4d8   :  { %v1354_v27 = vmul.f32 -1.442695, %v1032_v19  ;;  %v1356_v28 = vmul.f32 -1.442695, %v1075_v20  ;;  %v1036_v29 = vadd.f32 %v1035_v25, %v730_v13  ;;  %v1079_v30 = vadd.f32 %v1078_v26, %v738_v14  ;;  %v1037_v31 = vpop.f32.mrb[11].mxu0  ;;  %v1080_v32 = vpop.f32.mrb[11].mxu1 }
 0x4d9   :  { %v1355_v33 = vmul.f32 -1.442695, %v1034_v23  ;;  %v1357_v34 = vmul.f32 -1.442695, %v1077_v24  ;;  %v1038_v35 = vadd.f32 %v1037_v31, %v734_v15  ;;  %v1081_v36 = vadd.f32 %v1080_v32, %v742_v16 }
 0x4da   :  { %1618 = vpow2.f32 %v1354_v27  ;;  %v1360_v37 = vmul.f32 -1.442695, %v1036_v29  ;;  %v1362_v38 = vmul.f32 -1.442695, %v1079_v30 }
 0x4db   :  { %1620 = vpow2.f32 %v1356_v28  ;;  %v1361_v39 = vmul.f32 -1.442695, %v1038_v35  ;;  %v1363_v40 = vmul.f32 -1.442695, %v1081_v36 }
 0x4dc   :  { %1622 = vpow2.f32 %v1355_v33 }
 0x4dd   :  { %1624 = vpow2.f32 %v1357_v34 }
 0x4de   :  { %1626 = vpow2.f32 %v1360_v37 }
 0x4df   :  { %1628 = vpow2.f32 %v1362_v38 }
 0x4e0   :  { %1630 = vpow2.f32 %v1361_v39 }
 0x4e1   :  { %1632 = vpow2.f32 %v1363_v40 }
 0x4e4   :  { %v1619_v41 = vpop.eup %1618 }
 0x4e5   :  { %v1621_v42 = vpop.eup %1620  ;;  %v1162_v43 = vadd.f32 1.0, %v1619_v41 }
 0x4e6   :  { %v1623_v44 = vpop.eup %1622  ;;  %v1164_v45 = vadd.f32 1.0, %v1621_v42 }
 0x4e7   :  { %v1625_v46 = vpop.eup %1624  ;;  %1634 = vrcp.f32 %v1162_v43  ;;  %v1163_v47 = vadd.f32 1.0, %v1623_v44 }
 0x4e8   :  { %v1627_v48 = vpop.eup %1626  ;;  %1636 = vrcp.f32 %v1164_v45  ;;  %v1165_v49 = vadd.f32 1.0, %v1625_v46 }
 0x4e9   :  { %v1629_v50 = vpop.eup %1628  ;;  %1638 = vrcp.f32 %v1163_v47  ;;  %v1168_v51 = vadd.f32 1.0, %v1627_v48 }
 0x4ea   :  { %v1631_v52 = vpop.eup %1630  ;;  %1640 = vrcp.f32 %v1165_v49  ;;  %v1170_v53 = vadd.f32 1.0, %v1629_v50 }
 0x4eb   :  { %v1633_v54 = vpop.eup %1632  ;;  %1642 = vrcp.f32 %v1168_v51  ;;  %v1169_v55 = vadd.f32 1.0, %v1631_v52 }
 0x4ec   :  { %1644 = vrcp.f32 %v1170_v53  ;;  %v1171_v56 = vadd.f32 1.0, %v1633_v54 }
 0x4ed   :  { %1646 = vrcp.f32 %v1169_v55 }
 0x4ee   :  { %1648 = vrcp.f32 %v1171_v56 }
 0x4f1   :  { %v1635_v59 = vpop.eup %1634 }
 0x4f2   :  { %v1637_v60 = vpop.eup %1636 }
 0x4f3   :  { %v1639_v62 = vpop.eup %1638 }
 0x4f4   :  { %v1641_v1 = vpop.eup %1640  ;;  %v1372_v2 = vpack.c.bf16 %v1639_v62, %v1635_v59 }
 0x4f5   :  { %v1643_v3 = vpop.eup %1642  ;;  %v1373_v4 = vpack.c.bf16 %v1641_v1, %v1637_v60  ;;  %v1117_v5 = vpop.f32.mrb[12].mxu0 }
 0x4f6   :  { %v1645_v6 = vpop.eup %1644  ;;  %1234 = vst [vmem:[#allocation14] sm:$0xff] %v1372_v2  ;;  %v1118_v7 = vadd.f32 %v1117_v5, %v746_v61  ;;  %v1119_v9 = vpop.f32.mrb[13].mxu0 }
 0x4f7   :  { %v1647_v10 = vpop.eup %1646  ;;  %1235 = vst [vmem:[#allocation14 + $0x8] sm:$0xff] %v1373_v4  ;;  %v1120_v11 = vadd.f32 %v1119_v9, %v750_v63  ;;  %v1121_v8 = vpop.f32.mrb[14].mxu0 }
 0x4f8   :  { %v1649_v12 = vpop.eup %1648  ;;  %v1375_v13 = vpack.c.bf16 %v1647_v10, %v1643_v3  ;;  %v1358_v14 = vmul.f32 -1.442695, %v1118_v7  ;;  %v1122_v15 = vadd.f32 %v1121_v8, %v746_v61  ;;  %v1123_v16 = vpop.f32.mrb[15].mxu0 }
 0x4f9   :  { %v1376_v17 = vpack.c.bf16 %v1649_v12, %v1645_v6  ;;  %v1359_v0 = vmul.f32 -1.442695, %v1120_v11  ;;  %v1124_v18 = vadd.f32 %v1123_v16, %v750_v63 }
 0x4fa   :  { %1237 = vst [vmem:[#allocation14 + $0x18] sm:$0xff] %v1375_v13  ;;  %1650 = vpow2.f32 %v1358_v14  ;;  %v1364_v19 = vmul.f32 -1.442695, %v1122_v15 }
 0x4fb   :  { %1238 = vst [vmem:[#allocation14 + $0x20] sm:$0xff] %v1376_v17  ;;  %1652 = vpow2.f32 %v1359_v0  ;;  %v1365_v20 = vmul.f32 -1.442695, %v1124_v18 }
 0x4fc   :  { %1654 = vpow2.f32 %v1364_v19 }
 0x4fd   :  { %1656 = vpow2.f32 %v1365_v20 }
 0x504   :  { %v1651_v21 = vpop.eup %1650 }
 0x505   :  { %v1653_v22 = vpop.eup %1652  ;;  %v1166_v23 = vadd.f32 1.0, %v1651_v21 }
 0x506   :  { %v1655_v24 = vpop.eup %1654  ;;  %v1167_v25 = vadd.f32 1.0, %v1653_v22 }
 0x507   :  { %v1657_v26 = vpop.eup %1656  ;;  %1658 = vrcp.f32 %v1166_v23  ;;  %v1172_v27 = vadd.f32 1.0, %v1655_v24 }
 0x508   :  { %1660 = vrcp.f32 %v1167_v25  ;;  %v1173_v28 = vadd.f32 1.0, %v1657_v26 }
 0x509   :  { %1662 = vrcp.f32 %v1172_v27 }
 0x50a   :  { %1664 = vrcp.f32 %v1173_v28 }
 0x511   :  { %v1659_v29 = vpop.eup %1658 }
 0x512   :  { %v1661_v30 = vpop.eup %1660 }
 0x513   :  { %v1663_v31 = vpop.eup %1662  ;;  %v1374_v32 = vpack.c.bf16 %v1661_v30, %v1659_v29 }
 0x514   :  { %v1665_v33 = vpop.eup %1664 }
 0x515   :  { %1236 = vst [vmem:[#allocation14 + $0x10] sm:$0xff] %v1374_v32  ;;  %v1377_v34 = vpack.c.bf16 %v1665_v33, %v1663_v31 }
 0x517   :  { %1239 = vst [vmem:[#allocation14 + $0x28] sm:$0xff] %v1377_v34 }
 0x518   :  { %1809 = shalt.err (!%p1806_p10)
}
 0x519   :  { %s1810_s22 = scalar_lea.hbm %s2080_s11, 768 }
 0x51a   :  { %p1811_p11 = scmp.ne.s32.totalorder %s2080_s11, %s1810_s22  ;;  %p1814_p12 = scmp.lt.u32.totalorder %s1810_s22, %s2080_s11 }
 0x51c   :  { %p1816_p13 = pnand %p1814_p12, %p1811_p11 }
 0x51e   :  { %1819 = shalt.err (!%p1816_p13)
}
 0x51f   :  { %1251 = dma.vmem_to_hbm [thread:$0]  %s1246_s20, 768, %s2080_s11, [#allocation5], %s1840_s7, %s1840_s7, %s1841_s27  }
 0x520   :  { %1828 = dma.done.wait [#allocation5], 768  }
 0x521   :  { %1829 = vsyncadd [#allocation5], 4294966528 }
 0x522   :  { %1255 = vsyncpa [#allocation4], 1 }
 0x523   :  { %1256 = vsyncpa [#allocation7], 1 }
 0x524   :  { %1257 = vsyncpa [#allocation10], 1 }
 0x525   :  { %1258 = vsyncpa [#allocation13], 1 }
 0x526   :  { %1259 = vsyncpa [#allocation5], 1 }

</bundles_post_ra>
